<compile_context>
chip_gen: v5e
topology: v5e:2x2
jax: 0.10.0
libtpu: 0.0.40
codegen_flags: <defaults>
</compile_context>

<pallas_src>
import functools
import math

import numpy as np
import jax
import jax.numpy as jnp
from jax.experimental import pallas as pl
from jax.experimental.pallas import tpu as pltpu

EPS = 1e-5                                  # nn.LayerNorm default
_INV_SQRT2 = np.float32(1.0 / math.sqrt(2.0))
_MASK_NEG = np.float32(-1e30)               # additive bias for padded keys (exp underflows to 0)


def _layer_norm(v, g, b):
    # two-pass statistics (matches nn.LayerNorm numerics; avoids E[x^2]-E[x]^2 cancellation)
    mu = jnp.mean(v, axis=-1, keepdims=True)
    xc = v - mu
    var = jnp.mean(xc * xc, axis=-1, keepdims=True)
    return xc * jax.lax.rsqrt(var + EPS) * g + b


# ---------------- kernel 1: xp -> LN1 -> Q / K / V projections (lane-dense) ----------------
def _ln_qkv_kernel(xp_ref, g_ref, b_ref, wq_ref, wk_ref, wv_ref, q_ref, k_ref, v_ref):
    xn = _layer_norm(xp_ref[0], g_ref[0], b_ref[0]).astype(jnp.bfloat16)
    q_ref[0] = jnp.dot(xn, wq_ref[...], preferred_element_type=jnp.float32).astype(jnp.bfloat16)
    k_ref[0] = jnp.dot(xn, wk_ref[...], preferred_element_type=jnp.float32).astype(jnp.bfloat16)
    v_ref[0] = jnp.dot(xn, wv_ref[...], preferred_element_type=jnp.float32).astype(jnp.bfloat16)


# --------- kernel 2: flash attention over KV tiles + proj + LN2 + MLP + residuals ----------
def _attn_mlp_kernel(xp_ref, q_ref, k_ref, v_ref, bias_ref,
                     wproj_ref, bproj_ref, ln2_g_ref, ln2_b_ref,
                     w1_ref, b1_ref, w2_ref, b2_ref,
                     out_ref,
                     m_sc, l_sc, acc_sc, o_sc,
                     *, num_heads, masked):
    kv = pl.program_id(2)
    C = q_ref.shape[2]
    Dh = C // num_heads

    @pl.when(kv == 0)
    def _init():
        m_sc[...] = jnp.full(m_sc.shape, _MASK_NEG, m_sc.dtype)
        l_sc[...] = jnp.zeros(l_sc.shape, l_sc.dtype)
        acc_sc[...] = jnp.zeros(acc_sc.shape, acc_sc.dtype)

    # Online-softmax update for this KV tile, per head (2D matmuls on lane windows of the
    # lane-dense q/k/v tiles; running statistics live in VMEM scratch).
    for h in range(num_heads):
        q_h = q_ref[0, :, pl.ds(h * Dh, Dh)]                  # (TQ, Dh) bf16, scale folded in Wq
        k_h = k_ref[0, :, pl.ds(h * Dh, Dh)]                  # (TK, Dh) bf16
        v_h = v_ref[0, :, pl.ds(h * Dh, Dh)]                  # (TK, Dh) bf16
        s = jax.lax.dot_general(q_h, k_h, (((1,), (1,)), ((), ())),
                                preferred_element_type=jnp.float32)       # (TQ, TK) f32
        if masked:
            s = s + bias_ref[...]                             # -1e30 on padded keys
        m_prev = m_sc[h]                                      # (TQ, 1) f32
        m_new = jnp.maximum(m_prev, jnp.max(s, axis=-1, keepdims=True))
        alpha = jnp.exp(m_prev - m_new)
        p = jnp.exp(s - m_new)
        l_sc[h] = alpha * l_sc[h] + jnp.sum(p, axis=-1, keepdims=True)
        acc_sc[h] = alpha * acc_sc[h] + jnp.dot(p.astype(jnp.bfloat16), v_h,
                                                preferred_element_type=jnp.float32)
        m_sc[h] = m_new

    @pl.when(kv == pl.num_programs(2) - 1)
    def _finalize():
        # concatenate heads lane-dense once; fold the 1/l softmax normalization in here
        for h in range(num_heads):
            o_sc[:, pl.ds(h * Dh, Dh)] = (acc_sc[h] / l_sc[h]).astype(jnp.bfloat16)
        # single full-width (TQ,C)x(C,C) output projection (K=C instead of H small K=Dh matmuls)
        y = jnp.dot(o_sc[...], wproj_ref[...],
                    preferred_element_type=jnp.float32) + bproj_ref[0]
        x1 = xp_ref[0] + y                                    # residual 1 (drop_path = identity)
        xn2 = _layer_norm(x1, ln2_g_ref[0], ln2_b_ref[0])
        h1 = jnp.dot(xn2.astype(jnp.bfloat16), w1_ref[...],
                     preferred_element_type=jnp.float32) + b1_ref[0]
        # exact GELU (PyTorch nn.GELU default, approximate='none')
        # TODO(synk): tanh-approx GELU (EUP path) only if the numerics contract allows.
        h1 = 0.5 * h1 * (1.0 + jax.lax.erf(h1 * _INV_SQRT2))
        # TODO(synk): chunk the MLP hidden dim if the (TQ, 4C) f32 temp pressures v7x VMEM.
        h2 = jnp.dot(h1.astype(jnp.bfloat16), w2_ref[...],
                     preferred_element_type=jnp.float32) + b2_ref[0]
        out_ref[0] = x1 + h2                                  # residual 2 (drop_path = identity)


# --------------------------------------- wrapper -------------------------------------------
def _round_up(n, m):
    return ((n + m - 1) // m) * m


def _nbytes(shape, dtype):
    return int(np.prod(shape)) * jnp.dtype(dtype).itemsize


def _vmem_limit(entries, headroom_bytes=16 * 1024 * 1024):
    """Scoped-VMEM request derived from the actual block working set (not a fixed constant)."""
    total = sum(_nbytes(shape, dtype) * bufs for shape, dtype, bufs in entries) + headroom_bytes
    return int(min(max(total, 32 * 1024 * 1024), 56 * 1024 * 1024))  # stay under v7x's 64 MiB


def _const_spec(arr, grid_rank, single_buffer=False):
    zeros = (0,) * arr.ndim
    index_map = (lambda b, t: zeros) if grid_rank == 2 else (lambda b, t, s: zeros)
    kwargs = {}
    if single_buffer:
        # constant index_map -> one DMA total; don't double-buffer the big resident weights
        kwargs["pipeline_mode"] = pl.Buffered(1)
    return pl.BlockSpec(arr.shape, index_map, **kwargs)


def transformer_block(x, params, *, num_heads, pos_encoding=None,
                      q_tile=128, kv_tile=128, single_buffer_weights=True):
    """x: (B, N, C) float32.  params: dict of transposed weights / 2D biases."""
    B, N, C = x.shape
    assert C % num_heads == 0
    Dh = C // num_heads
    hidden = params["w1_t"].shape[1]
    scale = Dh ** (-0.5)                                       # scale_head=True

    # ---- single activation stream: xp = x (+ pos on the last P tokens), padded to tiles ----
    xp = x.astype(jnp.float32)
    if pos_encoding is not None:
        P = pos_encoding.shape[1]
        xp = xp.at[:, N - P:, :].add(pos_encoding.astype(jnp.float32))
    step = math.lcm(q_tile, kv_tile)
    n_pad = max(_round_up(N, step), step)
    masked = n_pad > N
    if masked:
        xp = jnp.pad(xp, ((0, 0), (0, n_pad - N), (0, 0)))
    # additive key-mask row: 0 for real tokens, -1e30 for padded keys
    key_bias = jnp.where(jnp.arange(n_pad)[None, :] < N, 0.0, _MASK_NEG).astype(jnp.float32)

    nq = n_pad // q_tile
    nkv = n_pad // kv_tile
    wbuf = 1 if single_buffer_weights else 2

    # bf16 weights for the MXU (f32 accumulation in-kernel); softmax scale folded into Wq.
    wqkv = params["wqkv_t"]
    wq = (wqkv[:, 0:C] * scale).astype(jnp.bfloat16)
    wk = wqkv[:, C:2 * C].astype(jnp.bfloat16)
    wv = wqkv[:, 2 * C:3 * C].astype(jnp.bfloat16)
    wproj = params["wproj_t"].astype(jnp.bfloat16)
    w1 = params["w1_t"].astype(jnp.bfloat16)
    w2 = params["w2_t"].astype(jnp.bfloat16)
    ln1_g, ln1_b = params["ln1_g"], params["ln1_b"]
    ln2_g, ln2_b = params["ln2_g"], params["ln2_b"]
    bproj, b1, b2 = params["bproj"], params["b1"], params["b2"]

    # ------------------------- kernel 1: LN1 + QKV projections -------------------------
    vmem1 = _vmem_limit([
        ((1, q_tile, C), jnp.float32, 2),             # xp tile
        ((1, C), jnp.float32, 4),                     # ln1 gamma / beta
        ((C, C), jnp.bfloat16, 3 * wbuf),             # wq, wk, wv
        ((1, q_tile, C), jnp.bfloat16, 6),            # q, k, v output tiles
    ])
    q, k, v = pl.pallas_call(
        _ln_qkv_kernel,
        out_shape=(jax.ShapeDtypeStruct((B, n_pad, C), jnp.bfloat16),) * 3,
        grid_spec=pltpu.PrefetchScalarGridSpec(
            num_scalar_prefetch=0,
            grid=(B, nq),
            in_specs=[
                pl.BlockSpec((1, q_tile, C), lambda b, t: (b, t, 0)),       # xp
                _const_spec(ln1_g, 2), _const_spec(ln1_b, 2),
                _const_spec(wq, 2, single_buffer_weights),
                _const_spec(wk, 2, single_buffer_weights),
                _const_spec(wv, 2, single_buffer_weights),
            ],
            out_specs=(pl.BlockSpec((1, q_tile, C), lambda b, t: (b, t, 0)),) * 3,
        ),
        compiler_params=pltpu.CompilerParams(
            dimension_semantics=("parallel", "parallel"),
            vmem_limit_bytes=vmem1),
    )(xp, ln1_g, ln1_b, wq, wk, wv)

    # ------------ kernel 2: flash attention + projection + LN2 + MLP + residuals ------------
    vmem2 = _vmem_limit([
        ((1, q_tile, C), jnp.float32, 2),             # xp tile (residual)
        ((1, q_tile, C), jnp.bfloat16, 2),            # q tile
        ((1, kv_tile, C), jnp.bfloat16, 4),           # k, v tiles (double-buffered over kv axis)
        ((1, kv_tile), jnp.float32, 2),               # key mask row
        ((C, C), jnp.bfloat16, wbuf),                 # wproj
        ((C, hidden), jnp.bfloat16, wbuf),            # w1
        ((hidden, C), jnp.bfloat16, wbuf),            # w2
        ((1, C), jnp.float32, 8),                     # bproj / ln2 gamma,beta / b2
        ((1, hidden), jnp.float32, 2),                # b1
        ((1, q_tile, C), jnp.float32, 2),             # output tile
        ((num_heads, q_tile, 1), jnp.float32, 2),     # m, l scratch
        ((num_heads, q_tile, _round_up(Dh, 128)), jnp.float32, 1),  # acc scratch (lane-padded)
        ((q_tile, C), jnp.bfloat16, 1),               # concatenated-head scratch
    ])
    out = pl.pallas_call(
        functools.partial(_attn_mlp_kernel, num_heads=num_heads, masked=masked),
        out_shape=jax.ShapeDtypeStruct((B, n_pad, C), jnp.float32),
        grid_spec=pltpu.PrefetchScalarGridSpec(
            num_scalar_prefetch=0,
            grid=(B, nq, nkv),
            in_specs=[
                pl.BlockSpec((1, q_tile, C), lambda b, t, s: (b, t, 0)),    # xp (residual base)
                pl.BlockSpec((1, q_tile, C), lambda b, t, s: (b, t, 0)),    # q  (per q tile)
                pl.BlockSpec((1, kv_tile, C), lambda b, t, s: (b, s, 0)),   # k  (per kv tile)
                pl.BlockSpec((1, kv_tile, C), lambda b, t, s: (b, s, 0)),   # v  (per kv tile)
                pl.BlockSpec((1, kv_tile), lambda b, t, s: (0, s)),         # key mask row
                _const_spec(wproj, 3, single_buffer_weights), _const_spec(bproj, 3),
                _const_spec(ln2_g, 3), _const_spec(ln2_b, 3),
                _const_spec(w1, 3, single_buffer_weights), _const_spec(b1, 3),
                _const_spec(w2, 3, single_buffer_weights), _const_spec(b2, 3),
            ],
            out_specs=pl.BlockSpec((1, q_tile, C), lambda b, t, s: (b, t, 0)),
            scratch_shapes=[
                pltpu.VMEM((num_heads, q_tile, 1), jnp.float32),    # running max
                pltpu.VMEM((num_heads, q_tile, 1), jnp.float32),    # running sum
                pltpu.VMEM((num_heads, q_tile, Dh), jnp.float32),   # running PV accumulator
                pltpu.VMEM((q_tile, C), jnp.bfloat16),              # concatenated heads
            ],
        ),
        compiler_params=pltpu.CompilerParams(
            dimension_semantics=("parallel", "parallel", "arbitrary"),
            vmem_limit_bytes=vmem2),
    )(xp, q, k, v, key_bias, wproj, bproj, ln2_g, ln2_b, w1, b1, w2, b2)

    return out[:, :N] if masked else out


# ---------------- pure-JAX reference (mirrors the PyTorch forward, f32) ----------------
def reference_block(x, p, *, num_heads, pos_encoding=None):
    if pos_encoding is not None:
        P = pos_encoding.shape[1]
        x = x.at[:, -P:, :].add(pos_encoding)
    B, N, C = x.shape
    Dh = C // num_heads
    scale = Dh ** (-0.5)

    def ln(v, g, b):
        mu = v.mean(-1, keepdims=True)
        var = ((v - mu) ** 2).mean(-1, keepdims=True)
        return (v - mu) / jnp.sqrt(var + EPS) * g[0] + b[0]

    xn = ln(x, p["ln1_g"], p["ln1_b"])
    qkv = xn @ p["wqkv_t"]
    qkv = qkv.reshape(B, N, 3, num_heads, Dh).transpose(2, 0, 3, 1, 4)
    q, k, v = qkv[0], qkv[1], qkv[2]
    attn = jnp.einsum("bhnd,bhmd->bhnm", q, k) * scale
    attn = jax.nn.softmax(attn, axis=-1)
    y = jnp.einsum("bhnm,bhmd->bhnd", attn, v).transpose(0, 2, 1, 3).reshape(B, N, C)
    y = y @ p["wproj_t"] + p["bproj"][0]
    x = x + y
    xn2 = ln(x, p["ln2_g"], p["ln2_b"])
    h = xn2 @ p["w1_t"] + p["b1"][0]
    h = 0.5 * h * (1.0 + jax.lax.erf(h / jnp.sqrt(2.0)))
    return x + h @ p["w2_t"] + p["b2"][0]


def init_params(key, dim, mlp_ratio, num_heads):
    hidden = int(dim * mlp_ratio)
    ks = jax.random.split(key, 4)
    std = 0.02
    # PyTorch Linear weights are (out, in); store transposed so kernels do x @ W.
    wqkv = jax.random.normal(ks[0], (3 * dim, dim), jnp.float32) * std
    wproj = jax.random.normal(ks[1], (dim, dim), jnp.float32) * std
    w1 = jax.random.normal(ks[2], (hidden, dim), jnp.float32) * std
    w2 = jax.random.normal(ks[3], (dim, hidden), jnp.float32) * std
    return {
        "ln1_g": jnp.ones((1, dim), jnp.float32),
        "ln1_b": jnp.zeros((1, dim), jnp.float32),
        "wqkv_t": wqkv.T,                       # (dim, 3*dim)
        "wproj_t": wproj.T,                     # (dim, dim)
        "bproj": jnp.zeros((1, dim), jnp.float32),
        "ln2_g": jnp.ones((1, dim), jnp.float32),
        "ln2_b": jnp.zeros((1, dim), jnp.float32),
        "w1_t": w1.T,                           # (dim, hidden)
        "b1": jnp.zeros((1, hidden), jnp.float32),
        "w2_t": w2.T,                           # (hidden, dim)
        "b2": jnp.zeros((1, dim), jnp.float32),
    }


def _run_case(key, *, B, N, C, num_heads, mlp_ratio, pos_shape):
    kx, kp, kpos = jax.random.split(key, 3)
    x = jax.random.normal(kx, (B, N, C), jnp.float32)
    params = init_params(kp, C, mlp_ratio, num_heads)
    pos = jax.random.normal(kpos, pos_shape, jnp.float32) * 0.1
    run = functools.partial(transformer_block, num_heads=num_heads, pos_encoding=pos)
    try:
        out = jax.block_until_ready(run(x, params))
    except Exception:
        # fall back if pl.Buffered(1) single-buffering is unsupported by this jax build
        out = jax.block_until_ready(run(x, params, single_buffer_weights=False))
    ref = reference_block(x, params, num_heads=num_heads, pos_encoding=pos)
    # bf16 matmul operands with f32 accumulation -> loosened tolerance vs the f32 reference
    np.testing.assert_allclose(np.asarray(out), np.asarray(ref), rtol=2e-2, atol=2e-2)


if __name__ == "__main__":
    key = jax.random.PRNGKey(0)
    k1, k2 = jax.random.split(key)
    # small shape; pos_encoding spans the whole (tiny) sequence
    _run_case(k1, B=2, N=8, C=32, num_heads=4, mlp_ratio=4.0, pos_shape=(2, 8, 32))
    # exercises the tiled flash path: N=200 -> padded to 256 (2 q tiles x 2 kv tiles, masked
    # padded keys), pos_encoding only on the last 50 tokens and broadcast over batch
    _run_case(k2, B=2, N=200, C=64, num_heads=4, mlp_ratio=4.0, pos_shape=(1, 50, 64))

    # TODO(synk): Dropout / DropPath only act in training mode; eval-mode identity implemented.
    print("KERNEL_OK")
</pallas_src>

<mosaic_0001>
module attributes {stable_mosaic.version = 11 : i64} {
  func.func @_ln_qkv_kernel(%arg0: i32, %arg1: i32, %arg2: memref<1x128x32xf32, #tpu.memory_space<vmem>>, %arg3: memref<1x32xf32, #tpu.memory_space<vmem>>, %arg4: memref<1x32xf32, #tpu.memory_space<vmem>>, %arg5: memref<32x32xbf16, #tpu.memory_space<vmem>>, %arg6: memref<32x32xbf16, #tpu.memory_space<vmem>>, %arg7: memref<32x32xbf16, #tpu.memory_space<vmem>>, %arg8: memref<1x128x32xbf16, #tpu.memory_space<vmem>>, %arg9: memref<1x128x32xbf16, #tpu.memory_space<vmem>>, %arg10: memref<1x128x32xbf16, #tpu.memory_space<vmem>>) attributes {dimension_semantics = [#tpu.dimension_semantics<parallel>, #tpu.dimension_semantics<parallel>], iteration_bounds = array<i64: 2, 1>, scalar_prefetch = 0 : i64, scratch_operands = 0 : i64, tpu.core_type = #tpu.core_type<tc>, window_params = [{transform_indices = @transform_0, window_bounds = array<i64: 1, 128, 32>}, {pipeline_mode = #tpu.pipeline_mode<synchronous>, transform_indices = @transform_1, window_bounds = array<i64: 1, 32>}, {pipeline_mode = #tpu.pipeline_mode<synchronous>, transform_indices = @transform_2, window_bounds = array<i64: 1, 32>}, {pipeline_mode = #tpu.pipeline_mode<synchronous>, transform_indices = @transform_3, window_bounds = array<i64: 32, 32>}, {pipeline_mode = #tpu.pipeline_mode<synchronous>, transform_indices = @transform_4, window_bounds = array<i64: 32, 32>}, {pipeline_mode = #tpu.pipeline_mode<synchronous>, transform_indices = @transform_5, window_bounds = array<i64: 32, 32>}, {transform_indices = @transform_6, window_bounds = array<i64: 1, 128, 32>}, {transform_indices = @transform_7, window_bounds = array<i64: 1, 128, 32>}, {transform_indices = @transform_8, window_bounds = array<i64: 1, 128, 32>}]} {
    %c0 = arith.constant 0 : index
    %c0_0 = arith.constant 0 : index
    %c0_1 = arith.constant 0 : index
    %0 = vector.load %arg2[%c0, %c0_0, %c0_1] : memref<1x128x32xf32, #tpu.memory_space<vmem>>, vector<1x128x32xf32>
    %1 = vector.shape_cast %0 : vector<1x128x32xf32> to vector<128x32xf32>
    %c0_2 = arith.constant 0 : index
    %c0_3 = arith.constant 0 : index
    %2 = vector.load %arg3[%c0_2, %c0_3] : memref<1x32xf32, #tpu.memory_space<vmem>>, vector<1x32xf32>
    %3 = vector.shape_cast %2 : vector<1x32xf32> to vector<32xf32>
    %c0_4 = arith.constant 0 : index
    %c0_5 = arith.constant 0 : index
    %4 = vector.load %arg4[%c0_4, %c0_5] : memref<1x32xf32, #tpu.memory_space<vmem>>, vector<1x32xf32>
    %5 = vector.shape_cast %4 : vector<1x32xf32> to vector<32xf32>
    %cst = arith.constant dense<0.000000e+00> : vector<128xf32>
    %6 = vector.multi_reduction <add>, %1, %cst [1] : vector<128x32xf32> to vector<128xf32>
    %7 = vector.shape_cast %6 : vector<128xf32> to vector<128x1xf32>
    %cst_6 = arith.constant 3.200000e+01 : f32
    %8 = vector.broadcast %cst_6 : f32 to vector<128x1xf32>
    %9 = arith.divf %7, %8 : vector<128x1xf32>
    %10 = vector.broadcast %9 : vector<128x1xf32> to vector<128x32xf32>
    %11 = arith.subf %1, %10 : vector<128x32xf32>
    %12 = arith.mulf %11, %11 : vector<128x32xf32>
    %cst_7 = arith.constant dense<0.000000e+00> : vector<128xf32>
    %13 = vector.multi_reduction <add>, %12, %cst_7 [1] : vector<128x32xf32> to vector<128xf32>
    %14 = vector.shape_cast %13 : vector<128xf32> to vector<128x1xf32>
    %cst_8 = arith.constant 3.200000e+01 : f32
    %15 = vector.broadcast %cst_8 : f32 to vector<128x1xf32>
    %16 = arith.divf %14, %15 : vector<128x1xf32>
    %cst_9 = arith.constant 9.99999974E-6 : f32
    %17 = vector.broadcast %cst_9 : f32 to vector<128x1xf32>
    %18 = arith.addf %16, %17 : vector<128x1xf32>
    %19 = math.rsqrt %18 : vector<128x1xf32>
    %20 = vector.broadcast %19 : vector<128x1xf32> to vector<128x32xf32>
    %21 = arith.mulf %11, %20 : vector<128x32xf32>
    %22 = vector.shape_cast %3 : vector<32xf32> to vector<1x32xf32>
    %23 = vector.broadcast %22 : vector<1x32xf32> to vector<128x32xf32>
    %24 = arith.mulf %21, %23 : vector<128x32xf32>
    %25 = vector.shape_cast %5 : vector<32xf32> to vector<1x32xf32>
    %26 = vector.broadcast %25 : vector<1x32xf32> to vector<128x32xf32>
    %27 = arith.addf %24, %26 : vector<128x32xf32>
    %28 = arith.truncf %27 : vector<128x32xf32> to vector<128x32xbf16>
    %c0_10 = arith.constant 0 : index
    %c0_11 = arith.constant 0 : index
    %29 = vector.load %arg5[%c0_10, %c0_11] : memref<32x32xbf16, #tpu.memory_space<vmem>>, vector<32x32xbf16>
    %cst_12 = arith.constant dense<0.000000e+00> : vector<128x32xf32>
    %30 = tpu.matmul %28, %29, %cst_12 {dimension_numbers = #tpu.dot_dimension_numbers<[1], [0], [0], [1], [0, 0, 1, 1], [], []>} : vector<128x32xbf16>, vector<32x32xbf16>, vector<128x32xf32> -> vector<128x32xf32>
    %31 = arith.truncf %30 : vector<128x32xf32> to vector<128x32xbf16>
    %c0_13 = arith.constant 0 : index
    %c0_14 = arith.constant 0 : index
    %c0_15 = arith.constant 0 : index
    %32 = vector.load %arg8[%c0_13, %c0_14, %c0_15] : memref<1x128x32xbf16, #tpu.memory_space<vmem>>, vector<1x128x32xbf16>
    %33 = vector.shape_cast %32 : vector<1x128x32xbf16> to vector<128x32xbf16>
    %34 = vector.shape_cast %31 : vector<128x32xbf16> to vector<1x128x32xbf16>
    tpu.vector_store %arg8[%c0_13, %c0_14, %c0_15], %34 {strides = array<i32>} : memref<1x128x32xbf16, #tpu.memory_space<vmem>>, vector<1x128x32xbf16>,
    %c0_16 = arith.constant 0 : index
    %c0_17 = arith.constant 0 : index
    %35 = vector.load %arg6[%c0_16, %c0_17] : memref<32x32xbf16, #tpu.memory_space<vmem>>, vector<32x32xbf16>
    %cst_18 = arith.constant dense<0.000000e+00> : vector<128x32xf32>
    %36 = tpu.matmul %28, %35, %cst_18 {dimension_numbers = #tpu.dot_dimension_numbers<[1], [0], [0], [1], [0, 0, 1, 1], [], []>} : vector<128x32xbf16>, vector<32x32xbf16>, vector<128x32xf32> -> vector<128x32xf32>
    %37 = arith.truncf %36 : vector<128x32xf32> to vector<128x32xbf16>
    %c0_19 = arith.constant 0 : index
    %c0_20 = arith.constant 0 : index
    %c0_21 = arith.constant 0 : index
    %38 = vector.load %arg9[%c0_19, %c0_20, %c0_21] : memref<1x128x32xbf16, #tpu.memory_space<vmem>>, vector<1x128x32xbf16>
    %39 = vector.shape_cast %38 : vector<1x128x32xbf16> to vector<128x32xbf16>
    %40 = vector.shape_cast %37 : vector<128x32xbf16> to vector<1x128x32xbf16>
    tpu.vector_store %arg9[%c0_19, %c0_20, %c0_21], %40 {strides = array<i32>} : memref<1x128x32xbf16, #tpu.memory_space<vmem>>, vector<1x128x32xbf16>,
    %c0_22 = arith.constant 0 : index
    %c0_23 = arith.constant 0 : index
    %41 = vector.load %arg7[%c0_22, %c0_23] : memref<32x32xbf16, #tpu.memory_space<vmem>>, vector<32x32xbf16>
    %cst_24 = arith.constant dense<0.000000e+00> : vector<128x32xf32>
    %42 = tpu.matmul %28, %41, %cst_24 {dimension_numbers = #tpu.dot_dimension_numbers<[1], [0], [0], [1], [0, 0, 1, 1], [], []>} : vector<128x32xbf16>, vector<32x32xbf16>, vector<128x32xf32> -> vector<128x32xf32>
    %43 = arith.truncf %42 : vector<128x32xf32> to vector<128x32xbf16>
    %c0_25 = arith.constant 0 : index
    %c0_26 = arith.constant 0 : index
    %c0_27 = arith.constant 0 : index
    %44 = vector.load %arg10[%c0_25, %c0_26, %c0_27] : memref<1x128x32xbf16, #tpu.memory_space<vmem>>, vector<1x128x32xbf16>
    %45 = vector.shape_cast %44 : vector<1x128x32xbf16> to vector<128x32xbf16>
    %46 = vector.shape_cast %43 : vector<128x32xbf16> to vector<1x128x32xbf16>
    tpu.vector_store %arg10[%c0_25, %c0_26, %c0_27], %46 {strides = array<i32>} : memref<1x128x32xbf16, #tpu.memory_space<vmem>>, vector<1x128x32xbf16>,
    return
  }
  func.func @transform_0(%arg0: i32, %arg1: i32) -> (i32, i32, i32) {
    %c0_i32 = arith.constant 0 : i32
    %c0_i32_0 = arith.constant 0 : i32
    return %arg0, %arg1, %c0_i32 : i32, i32, i32
  }
  func.func @transform_1(%arg0: i32, %arg1: i32) -> (i32, i32) {
    %c0_i32 = arith.constant 0 : i32
    %c0_i32_0 = arith.constant 0 : i32
    %c0_i32_1 = arith.constant 0 : i32
    return %c0_i32, %c0_i32_0 : i32, i32
  }
  func.func @transform_2(%arg0: i32, %arg1: i32) -> (i32, i32) {
    %c0_i32 = arith.constant 0 : i32
    %c0_i32_0 = arith.constant 0 : i32
    %c0_i32_1 = arith.constant 0 : i32
    return %c0_i32, %c0_i32_0 : i32, i32
  }
  func.func @transform_3(%arg0: i32, %arg1: i32) -> (i32, i32) {
    %c0_i32 = arith.constant 0 : i32
    %c0_i32_0 = arith.constant 0 : i32
    %c0_i32_1 = arith.constant 0 : i32
    return %c0_i32, %c0_i32_0 : i32, i32
  }
  func.func @transform_4(%arg0: i32, %arg1: i32) -> (i32, i32) {
    %c0_i32 = arith.constant 0 : i32
    %c0_i32_0 = arith.constant 0 : i32
    %c0_i32_1 = arith.constant 0 : i32
    return %c0_i32, %c0_i32_0 : i32, i32
  }
  func.func @transform_5(%arg0: i32, %arg1: i32) -> (i32, i32) {
    %c0_i32 = arith.constant 0 : i32
    %c0_i32_0 = arith.constant 0 : i32
    %c0_i32_1 = arith.constant 0 : i32
    return %c0_i32, %c0_i32_0 : i32, i32
  }
  func.func @transform_6(%arg0: i32, %arg1: i32) -> (i32, i32, i32) {
    %c0_i32 = arith.constant 0 : i32
    %c0_i32_0 = arith.constant 0 : i32
    return %arg0, %arg1, %c0_i32 : i32, i32, i32
  }
  func.func @transform_7(%arg0: i32, %arg1: i32) -> (i32, i32, i32) {
    %c0_i32 = arith.constant 0 : i32
    %c0_i32_0 = arith.constant 0 : i32
    return %arg0, %arg1, %c0_i32 : i32, i32, i32
  }
  func.func @transform_8(%arg0: i32, %arg1: i32) -> (i32, i32, i32) {
    %c0_i32 = arith.constant 0 : i32
    %c0_i32_0 = arith.constant 0 : i32
    return %arg0, %arg1, %c0_i32 : i32, i32, i32
  }
}

module attributes {stable_mosaic.version = 11 : i64} {
  func.func @_ln_qkv_kernel(%arg0: i32, %arg1: i32, %arg2: memref<1x128x32xf32, #tpu.memory_space<vmem>>, %arg3: memref<1x32xf32, #tpu.memory_space<vmem>>, %arg4: memref<1x32xf32, #tpu.memory_space<vmem>>, %arg5: memref<32x32xbf16, #tpu.memory_space<vmem>>, %arg6: memref<32x32xbf16, #tpu.memory_space<vmem>>, %arg7: memref<32x32xbf16, #tpu.memory_space<vmem>>, %arg8: memref<1x128x32xbf16, #tpu.memory_space<vmem>>, %arg9: memref<1x128x32xbf16, #tpu.memory_space<vmem>>, %arg10: memref<1x128x32xbf16, #tpu.memory_space<vmem>>) attributes {dimension_semantics = [#tpu.dimension_semantics<parallel>, #tpu.dimension_semantics<parallel>], iteration_bounds = array<i64: 2, 1>, scalar_prefetch = 0 : i64, scratch_operands = 0 : i64, tpu.core_type = #tpu.core_type<tc>, window_params = [{transform_indices = @transform_0, window_bounds = array<i64: 1, 128, 32>}, {pipeline_mode = #tpu.pipeline_mode<synchronous>, transform_indices = @transform_1, window_bounds = array<i64: 1, 32>}, {pipeline_mode = #tpu.pipeline_mode<synchronous>, transform_indices = @transform_2, window_bounds = array<i64: 1, 32>}, {pipeline_mode = #tpu.pipeline_mode<synchronous>, transform_indices = @transform_3, window_bounds = array<i64: 32, 32>}, {pipeline_mode = #tpu.pipeline_mode<synchronous>, transform_indices = @transform_4, window_bounds = array<i64: 32, 32>}, {pipeline_mode = #tpu.pipeline_mode<synchronous>, transform_indices = @transform_5, window_bounds = array<i64: 32, 32>}, {transform_indices = @transform_6, window_bounds = array<i64: 1, 128, 32>}, {transform_indices = @transform_7, window_bounds = array<i64: 1, 128, 32>}, {transform_indices = @transform_8, window_bounds = array<i64: 1, 128, 32>}]} {
    %c0 = arith.constant 0 : index
    %c0_0 = arith.constant 0 : index
    %c0_1 = arith.constant 0 : index
    %0 = vector.load %arg2[%c0, %c0_0, %c0_1] : memref<1x128x32xf32, #tpu.memory_space<vmem>>, vector<1x128x32xf32>
    %1 = vector.shape_cast %0 : vector<1x128x32xf32> to vector<128x32xf32>
    %c0_2 = arith.constant 0 : index
    %c0_3 = arith.constant 0 : index
    %2 = vector.load %arg3[%c0_2, %c0_3] : memref<1x32xf32, #tpu.memory_space<vmem>>, vector<1x32xf32>
    %3 = vector.shape_cast %2 : vector<1x32xf32> to vector<32xf32>
    %c0_4 = arith.constant 0 : index
    %c0_5 = arith.constant 0 : index
    %4 = vector.load %arg4[%c0_4, %c0_5] : memref<1x32xf32, #tpu.memory_space<vmem>>, vector<1x32xf32>
    %5 = vector.shape_cast %4 : vector<1x32xf32> to vector<32xf32>
    %cst = arith.constant dense<0.000000e+00> : vector<128xf32>
    %6 = vector.multi_reduction <add>, %1, %cst [1] : vector<128x32xf32> to vector<128xf32>
    %7 = vector.shape_cast %6 : vector<128xf32> to vector<128x1xf32>
    %cst_6 = arith.constant 3.200000e+01 : f32
    %8 = vector.broadcast %cst_6 : f32 to vector<128x1xf32>
    %9 = arith.divf %7, %8 : vector<128x1xf32>
    %10 = vector.broadcast %9 : vector<128x1xf32> to vector<128x32xf32>
    %11 = arith.subf %1, %10 : vector<128x32xf32>
    %12 = arith.mulf %11, %11 : vector<128x32xf32>
    %cst_7 = arith.constant dense<0.000000e+00> : vector<128xf32>
    %13 = vector.multi_reduction <add>, %12, %cst_7 [1] : vector<128x32xf32> to vector<128xf32>
    %14 = vector.shape_cast %13 : vector<128xf32> to vector<128x1xf32>
    %cst_8 = arith.constant 3.200000e+01 : f32
    %15 = vector.broadcast %cst_8 : f32 to vector<128x1xf32>
    %16 = arith.divf %14, %15 : vector<128x1xf32>
    %cst_9 = arith.constant 9.99999974E-6 : f32
    %17 = vector.broadcast %cst_9 : f32 to vector<128x1xf32>
    %18 = arith.addf %16, %17 : vector<128x1xf32>
    %19 = math.rsqrt %18 : vector<128x1xf32>
    %20 = vector.broadcast %19 : vector<128x1xf32> to vector<128x32xf32>
    %21 = arith.mulf %11, %20 : vector<128x32xf32>
    %22 = vector.shape_cast %3 : vector<32xf32> to vector<1x32xf32>
    %23 = vector.broadcast %22 : vector<1x32xf32> to vector<128x32xf32>
    %24 = arith.mulf %21, %23 : vector<128x32xf32>
    %25 = vector.shape_cast %5 : vector<32xf32> to vector<1x32xf32>
    %26 = vector.broadcast %25 : vector<1x32xf32> to vector<128x32xf32>
    %27 = arith.addf %24, %26 : vector<128x32xf32>
    %28 = arith.truncf %27 : vector<128x32xf32> to vector<128x32xbf16>
    %c0_10 = arith.constant 0 : index
    %c0_11 = arith.constant 0 : index
    %29 = vector.load %arg5[%c0_10, %c0_11] : memref<32x32xbf16, #tpu.memory_space<vmem>>, vector<32x32xbf16>
    %cst_12 = arith.constant dense<0.000000e+00> : vector<128x32xf32>
    %30 = tpu.matmul %28, %29, %cst_12 {dimension_numbers = #tpu.dot_dimension_numbers<[1], [0], [0], [1], [0, 0, 1, 1], [], []>} : vector<128x32xbf16>, vector<32x32xbf16>, vector<128x32xf32> -> vector<128x32xf32>
    %31 = arith.truncf %30 : vector<128x32xf32> to vector<128x32xbf16>
    %c0_13 = arith.constant 0 : index
    %c0_14 = arith.constant 0 : index
    %c0_15 = arith.constant 0 : index
    %32 = vector.load %arg8[%c0_13, %c0_14, %c0_15] : memref<1x128x32xbf16, #tpu.memory_space<vmem>>, vector<1x128x32xbf16>
    %33 = vector.shape_cast %32 : vector<1x128x32xbf16> to vector<128x32xbf16>
    %34 = vector.shape_cast %31 : vector<128x32xbf16> to vector<1x128x32xbf16>
    tpu.vector_store %arg8[%c0_13, %c0_14, %c0_15], %34 {strides = array<i32>} : memref<1x128x32xbf16, #tpu.memory_space<vmem>>, vector<1x128x32xbf16>,
    %c0_16 = arith.constant 0 : index
    %c0_17 = arith.constant 0 : index
    %35 = vector.load %arg6[%c0_16, %c0_17] : memref<32x32xbf16, #tpu.memory_space<vmem>>, vector<32x32xbf16>
    %cst_18 = arith.constant dense<0.000000e+00> : vector<128x32xf32>
    %36 = tpu.matmul %28, %35, %cst_18 {dimension_numbers = #tpu.dot_dimension_numbers<[1], [0], [0], [1], [0, 0, 1, 1], [], []>} : vector<128x32xbf16>, vector<32x32xbf16>, vector<128x32xf32> -> vector<128x32xf32>
    %37 = arith.truncf %36 : vector<128x32xf32> to vector<128x32xbf16>
    %c0_19 = arith.constant 0 : index
    %c0_20 = arith.constant 0 : index
    %c0_21 = arith.constant 0 : index
    %38 = vector.load %arg9[%c0_19, %c0_20, %c0_21] : memref<1x128x32xbf16, #tpu.memory_space<vmem>>, vector<1x128x32xbf16>
    %39 = vector.shape_cast %38 : vector<1x128x32xbf16> to vector<128x32xbf16>
    %40 = vector.shape_cast %37 : vector<128x32xbf16> to vector<1x128x32xbf16>
    tpu.vector_store %arg9[%c0_19, %c0_20, %c0_21], %40 {strides = array<i32>} : memref<1x128x32xbf16, #tpu.memory_space<vmem>>, vector<1x128x32xbf16>,
    %c0_22 = arith.constant 0 : index
    %c0_23 = arith.constant 0 : index
    %41 = vector.load %arg7[%c0_22, %c0_23] : memref<32x32xbf16, #tpu.memory_space<vmem>>, vector<32x32xbf16>
    %cst_24 = arith.constant dense<0.000000e+00> : vector<128x32xf32>
    %42 = tpu.matmul %28, %41, %cst_24 {dimension_numbers = #tpu.dot_dimension_numbers<[1], [0], [0], [1], [0, 0, 1, 1], [], []>} : vector<128x32xbf16>, vector<32x32xbf16>, vector<128x32xf32> -> vector<128x32xf32>
    %43 = arith.truncf %42 : vector<128x32xf32> to vector<128x32xbf16>
    %c0_25 = arith.constant 0 : index
    %c0_26 = arith.constant 0 : index
    %c0_27 = arith.constant 0 : index
    %44 = vector.load %arg10[%c0_25, %c0_26, %c0_27] : memref<1x128x32xbf16, #tpu.memory_space<vmem>>, vector<1x128x32xbf16>
    %45 = vector.shape_cast %44 : vector<1x128x32xbf16> to vector<128x32xbf16>
    %46 = vector.shape_cast %43 : vector<128x32xbf16> to vector<1x128x32xbf16>
    tpu.vector_store %arg10[%c0_25, %c0_26, %c0_27], %46 {strides = array<i32>} : memref<1x128x32xbf16, #tpu.memory_space<vmem>>, vector<1x128x32xbf16>,
    return
  }
  func.func @transform_0(%arg0: i32, %arg1: i32) -> (i32, i32, i32) {
    %c0_i32 = arith.constant 0 : i32
    %c0_i32_0 = arith.constant 0 : i32
    return %arg0, %arg1, %c0_i32 : i32, i32, i32
  }
  func.func @transform_1(%arg0: i32, %arg1: i32) -> (i32, i32) {
    %c0_i32 = arith.constant 0 : i32
    %c0_i32_0 = arith.constant 0 : i32
    %c0_i32_1 = arith.constant 0 : i32
    return %c0_i32, %c0_i32_0 : i32, i32
  }
  func.func @transform_2(%arg0: i32, %arg1: i32) -> (i32, i32) {
    %c0_i32 = arith.constant 0 : i32
    %c0_i32_0 = arith.constant 0 : i32
    %c0_i32_1 = arith.constant 0 : i32
    return %c0_i32, %c0_i32_0 : i32, i32
  }
  func.func @transform_3(%arg0: i32, %arg1: i32) -> (i32, i32) {
    %c0_i32 = arith.constant 0 : i32
    %c0_i32_0 = arith.constant 0 : i32
    %c0_i32_1 = arith.constant 0 : i32
    return %c0_i32, %c0_i32_0 : i32, i32
  }
  func.func @transform_4(%arg0: i32, %arg1: i32) -> (i32, i32) {
    %c0_i32 = arith.constant 0 : i32
    %c0_i32_0 = arith.constant 0 : i32
    %c0_i32_1 = arith.constant 0 : i32
    return %c0_i32, %c0_i32_0 : i32, i32
  }
  func.func @transform_5(%arg0: i32, %arg1: i32) -> (i32, i32) {
    %c0_i32 = arith.constant 0 : i32
    %c0_i32_0 = arith.constant 0 : i32
    %c0_i32_1 = arith.constant 0 : i32
    return %c0_i32, %c0_i32_0 : i32, i32
  }
  func.func @transform_6(%arg0: i32, %arg1: i32) -> (i32, i32, i32) {
    %c0_i32 = arith.constant 0 : i32
    %c0_i32_0 = arith.constant 0 : i32
    return %arg0, %arg1, %c0_i32 : i32, i32, i32
  }
  func.func @transform_7(%arg0: i32, %arg1: i32) -> (i32, i32, i32) {
    %c0_i32 = arith.constant 0 : i32
    %c0_i32_0 = arith.constant 0 : i32
    return %arg0, %arg1, %c0_i32 : i32, i32, i32
  }
  func.func @transform_8(%arg0: i32, %arg1: i32) -> (i32, i32, i32) {
    %c0_i32 = arith.constant 0 : i32
    %c0_i32_0 = arith.constant 0 : i32
    return %arg0, %arg1, %c0_i32 : i32, i32, i32
  }
}

</mosaic_0001>

<bundles_post_ra>
// kernel: tpu_custom_call.1
= control target key start
LH: loop header
LB: loop body
LE: loop exit
PB: predicated region body
PF: predicated region fallthrough
CT: control target
= control target key end

     0   :  { %s1530_s27 = smov 0   ;;  %s1532_s28 = smov 0   ;;  %s2124_s0 = inlined_call_operand.vmem [shape: f32[2,128,32], index: 0, kind: input, shape index: {}]   ;;  %s2125_s1 = inlined_call_operand.vmem [shape: f32[1,32], index: 1, kind: input, shape index: {}]   ;;  %s2126_s2 = inlined_call_operand.vmem [shape: f32[1,32], index: 2, kind: input, shape index: {}]   ;;  %s2127_s3 = inlined_call_operand.vmem [shape: bf16[32,32], index: 3, kind: input, shape index: {}]   ;;  %s2128_s4 = inlined_call_operand.vmem [shape: bf16[32,32], index: 4, kind: input, shape index: {}]   ;;  %s2129_s5 = inlined_call_operand.vmem [shape: bf16[32,32], index: 5, kind: input, shape index: {}]   ;;  %s2130_s6 = inlined_call_operand.vmem [shape: bf16[2,128,32], index: 6, kind: output, shape index: {0}]   ;;  %s2131_s7 = inlined_call_operand.vmem [shape: bf16[2,128,32], index: 7, kind: output, shape index: {1}]   ;;  %s2132_s8 = inlined_call_operand.vmem [shape: bf16[2,128,32], index: 8, kind: output, shape index: {2}]  }
   0x1   :  { %s1534_s29 = smov 0  }
   0x2 LB: > { %s31_s30 = sadd.s32 1, %s1478_s28  ;;  %p1324_p0 = scmp.ge.s32.totalorder %s1482_s29, 1  ;;  %s1482_s29 = sphi %s1534_s29, %s19_s29   ;;  %s1478_s28 = sphi %s1532_s28, %s2146_s28   ;;  %s1474_s27 = sphi %s1530_s27, %s2145_s27  }
   0x3   : > { %p33_p1 = scmp.ge.s32.totalorder %s31_s30, 2  ;;  %p292_p2 = scmp.lt.s32.totalorder %s1482_s29, 3 }
   0x5   : > { %s2148_s30 = smov (%p33_p1, %s31_s30), 0  ;;  %p293_p3 = pnand %p1324_p0, %p292_p2 }
   0x6   : > { %p353_p4 = scmp.lt.s32.totalorder (!%p293_p3), %s1474_s27, 1 }
   0x7   : > { %296 = sbr.rel (%p293_p3) target bundleno = 604 (0x25c), region = 44 }
   0xc   : > { %s2150_s27 = smov (!%p353_p4, %s1474_s27), 1  ;;  %vm411_vm0 = vcmask 261120   ;;  %v1484_v20 = vmov 32.0  }
   0xd   : > { %s1383_s9 = sshll.u32 %s2150_s27, 7  ;;  %1426 = vrcp.f32 %v1484_v20  ;;  %s1936_s11 = sshll.u32 %s2150_s27, 6 }
   0xe   : > { %s1554_s12 = scalar_lea.vmem %s2124_s0, %s1383_s9  ;;  %s1947_s27 = scalar_lea.vmem %s2130_s6, %s1936_s11 }
   0xf   : > { %v405_v0 = vld [vmem:[%s1554_s12 + $0x60] sm:$0xff]  ;;  %v395_v4 = vld [vmem:[%s1554_s12 + $0x10] sm:$0xff]  ;;  %v406_v6 = vld [vmem:[%s1554_s12 + $0x68] sm:$0xff]  ;;  %s1954_s16 = scalar_lea.vmem %s2131_s7, %s1936_s11  ;;  %s1986_s19 = scalar_lea.vmem %s2132_s8, %s1936_s11 }
  0x10   : > { %v393_v1 = vld [vmem:[%s1554_s12] sm:$0xff]  ;;  %v448_v2 = vsel %vm411_vm0, %v405_v0, 0.0  ;;  %v418_v5 = vsel %vm411_vm0, %v395_v4, 0.0  ;;  %v394_v7 = vld [vmem:[%s1554_s12 + $0x8] sm:$0xff]  ;;  %v1565_v8 = vld [vmem:[%s1554_s12 + $0x18] sm:$0xff]  ;;  %v451_v9 = vsel %vm411_vm0, %v406_v6, 0.0 }
  0x11   : > { %v412_v3 = vsel %vm411_vm0, %v393_v1, 0.0  ;;  %449 = vadd.xlane.f32.xlu1 %v448_v2  ;;  %419 = vadd.xlane.f32.xlu2 %v418_v5  ;;  %v415_v10 = vsel %vm411_vm0, %v394_v7, 0.0  ;;  %v421_v11 = vsel %vm411_vm0, %v1565_v8, 0.0  ;;  %v407_v12 = vld [vmem:[%s1554_s12 + $0x70] sm:$0xff]  ;;  %v408_v13 = vld [vmem:[%s1554_s12 + $0x78] sm:$0xff]  ;;  %v1574_v14 = vld [vmem:[%s1554_s12 + $0x20] sm:$0xff] }
  0x12   : > { %413 = vadd.xlane.f32.xlu0 %v412_v3  ;;  %v454_v15 = vsel %vm411_vm0, %v407_v12, 0.0  ;;  %v457_v16 = vsel %vm411_vm0, %v408_v13, 0.0  ;;  %v424_v17 = vsel %vm411_vm0, %v1574_v14, 0.0  ;;  %v1581_v18 = vld [vmem:[%s1554_s12 + $0x28] sm:$0xff]  ;;  %v1603_v43 = vld [vmem:[%s1554_s12 + $0x38] sm:$0xff]  ;;  %v1627_v60 = vld [vmem:[%s1554_s12 + $0x30] sm:$0xff] }
  0x13   : > { %v427_v19 = vsel %vm411_vm0, %v1581_v18, 0.0  ;;  %v1427_v21 = vpop.eup %1426  ;;  %v433_v48 = vsel %vm411_vm0, %v1603_v43, 0.0 }
  0x14   : > { %v461_v22 = vmul.f32 32.0, %v1427_v21  ;;  %vm465_vm1 = vweird.f32 %v1427_v21 }
  0x16   : > { %v462_v23 = vsub.f32 1.0, %v461_v22  ;;  %v1673_v22 = vld [vmem:[%s1554_s12 + $0x58] sm:$0xff] }
  0x18   : > { %v463_v24 = vmul.f32 %v1427_v21, %v462_v23 }
  0x19   : > { %452 = vadd.xlane.f32.xlu1 %v451_v9  ;;  %422 = vadd.xlane.f32.xlu2 %v421_v11 }
  0x1a   : > { %416 = vadd.xlane.f32.xlu0 %v415_v10  ;;  %v464_v25 = vadd.f32 %v1427_v21, %v463_v24  ;;  %v445_v24 = vsel %vm411_vm0, %v1673_v22, 0.0 }
  0x1c   : > { %v1585_v26 = vsel %vm465_vm1, %v1427_v21, %v464_v25 }
  0x21   : > { %458 = vadd.xlane.f32.xlu1 %v457_v16  ;;  %425 = vadd.xlane.f32.xlu2 %v424_v17  ;;  %v1662_v16 = vld [vmem:[%s1554_s12 + $0x40] sm:$0xff] }
  0x22   : > { %455 = vadd.xlane.f32.xlu0 %v454_v15  ;;  %v1658_v15 = vld [vmem:[%s1554_s12 + $0x50] sm:$0xff]  ;;  %v436_v20 = vsel %vm411_vm0, %v1662_v16, 0.0 }
  0x2a   : > { %428 = vadd.xlane.f32.xlu0 %v427_v19  ;;  %v442_v19 = vsel %vm411_vm0, %v1658_v15, 0.0 }
  0x84   : > { %v450_v27 = vpop.xlane.xlu1 %449  ;;  %v420_v31 = vpop.xlane.xlu2 %419 }
  0x85   : > { %v414_v28 = vpop.xlane.xlu0 %413  ;;  %v479_v29 = vmul.f32 %v1585_v26, %v450_v27  ;;  %v469_v42 = vmul.f32 %v1585_v26, %v420_v31  ;;  %v1390_v31 = vld [vmem:[%s2128_s4 + $0x8] sm:$0xff] }
  0x86   : > { %v467_v30 = vmul.f32 %v1585_v26, %v414_v28  ;;  %961 = vmatpush.bf16.msra.mxu1 %v1390_v31 }
  0x87   : > { %v1589_v32 = vsub.f32 %v405_v0, %v479_v29  ;;  %v1609_v47 = vsub.f32 %v395_v4, %v469_v42 }
  0x88   : > { %v1591_v33 = vsub.f32 %v393_v1, %v467_v30  ;;  %v430_v1 = vsel %vm411_vm0, %v1627_v60, 0.0  ;;  %v1388_v30 = vld [vmem:[%s2127_s3 + $0x8] sm:$0xff] }
  0x89   : > { %v511_v34 = vmul.f32 %v1589_v32, %v1589_v32  ;;  %v501_v57 = vmul.f32 %v1609_v47, %v1609_v47  ;;  %863 = vmatpush.bf16.msra.mxu0 %v1388_v30  ;;  %1393 = vmatpush.bf16.msra.mxu3 %v1388_v30 }
  0x8a   : > { %v499_v35 = vmul.f32 %v1591_v33, %v1591_v33 }
  0x8b   : > { %v551_v36 = vsel %vm411_vm0, %v511_v34, 0.0  ;;  %v521_v62 = vsel %vm411_vm0, %v501_v57, 0.0  ;;  %v1691_v34 = vld [vmem:[%s2129_s5 + $0x8] sm:$0xff] }
  0x8c   : > { %v515_v37 = vsel %vm411_vm0, %v499_v35, 0.0  ;;  %v453_v38 = vpop.xlane.xlu1 %452  ;;  %552 = vadd.xlane.f32.xlu0 %v551_v36  ;;  %v423_v46 = vpop.xlane.xlu2 %422  ;;  %1058 = vmatpush.bf16.msra.mxu2 %v1691_v34 }
  0x8d   : > { %516 = vadd.xlane.f32.xlu1 %v515_v37  ;;  %v417_v39 = vpop.xlane.xlu0 %416  ;;  %v480_v40 = vmul.f32 %v1585_v26, %v453_v38  ;;  %v470_v58 = vmul.f32 %v1585_v26, %v423_v46  ;;  %v1387_v37 = vld [vmem:[%s2127_s3] sm:$0xff] }
  0x8e   : > { %v468_v41 = vmul.f32 %v1585_v26, %v417_v39  ;;  %v1389_v38 = vld [vmem:[%s2128_s4] sm:$0xff]  ;;  %864 = vmatpush.bf16.msra.mxu0 %v1387_v37  ;;  %1394 = vmatpush.bf16.msra.mxu3 %v1387_v37 }
  0x8f   : > { %v1605_v44 = vsub.f32 %v406_v6, %v480_v40  ;;  %v1635_v0 = vsub.f32 %v1565_v8, %v470_v58  ;;  %v1705_v39 = vld [vmem:[%s2129_s5] sm:$0xff]  ;;  %962 = vmatpush.bf16.msra.mxu1 %v1389_v38 }
  0x90   : > { %v1607_v45 = vsub.f32 %v394_v7, %v468_v41  ;;  %v1646_v7 = vld [vmem:[%s1554_s12 + $0x48] sm:$0xff]  ;;  %1059 = vmatpush.bf16.msra.mxu2 %v1705_v39 }
  0x91   : > { %v512_v49 = vmul.f32 %v1605_v44, %v1605_v44  ;;  %v502_v6 = vmul.f32 %v1635_v0, %v1635_v0  ;;  %v439_v10 = vsel %vm411_vm0, %v1646_v7, 0.0 }
  0x92   : > { %v500_v50 = vmul.f32 %v1607_v45, %v1607_v45  ;;  %1395 = vmatpush.bf16.msrb.mxu3 %v1390_v31 }
  0x93   : > { %v554_v51 = vsel %vm411_vm0, %v512_v49, 0.0  ;;  %v524_v11 = vsel %vm411_vm0, %v502_v6, 0.0 }
  0x94   : > { %v518_v52 = vsel %vm411_vm0, %v500_v50, 0.0  ;;  %434 = vadd.xlane.f32.xlu0 %v433_v48  ;;  %v459_v54 = vpop.xlane.xlu1 %458  ;;  %v426_v2 = vpop.xlane.xlu2 %425 }
  0x95   : > { %555 = vadd.xlane.f32.xlu1 %v554_v51  ;;  %v456_v53 = vpop.xlane.xlu0 %455  ;;  %519 = vadd.xlane.f32.xlu2 %v518_v52  ;;  %v482_v56 = vmul.f32 %v1585_v26, %v459_v54  ;;  %v471_v4 = vmul.f32 %v1585_v26, %v426_v2 }
  0x96   : > { %v481_v55 = vmul.f32 %v1585_v26, %v456_v53  ;;  %1396 = vmatpush.bf16.msrb.mxu3 %v1389_v38 }
  0x97   : > { %v1629_v61 = vsub.f32 %v408_v13, %v482_v56  ;;  %v1649_v8 = vsub.f32 %v1574_v14, %v471_v4 }
  0x98   : > { %v1624_v59 = vsub.f32 %v407_v12, %v481_v55 }
  0x99   : > { %v514_v5 = vmul.f32 %v1629_v61, %v1629_v61  ;;  %v503_v13 = vmul.f32 %v1649_v8, %v1649_v8 }
  0x9a   : > { %v513_v63 = vmul.f32 %v1624_v59, %v1624_v59 }
  0x9b   : > { %v560_v9 = vsel %vm411_vm0, %v514_v5, 0.0  ;;  %v527_v17 = vsel %vm411_vm0, %v503_v13, 0.0 }
  0x9c   : > { %v557_v3 = vsel %vm411_vm0, %v513_v63, 0.0 }
  0x9d   : > { %522 = vadd.xlane.f32.xlu1 %v521_v62  ;;  %558 = vadd.xlane.f32.xlu0 %v557_v3  ;;  %v429_v12 = vpop.xlane.xlu0 %428 }
  0x9e   : > { %431 = vadd.xlane.f32.xlu2 %v430_v1  ;;  %v472_v14 = vmul.f32 %v1585_v26, %v429_v12 }
  0xa0   : > { %v1670_v21 = vsub.f32 %v1581_v18, %v472_v14 }
  0xa2   : > { %v504_v23 = vmul.f32 %v1670_v21, %v1670_v21 }
  0xa4   : > { %v530_v25 = vsel %vm411_vm0, %v504_v23, 0.0 }
  0xa5   : > { %561 = vadd.xlane.f32.xlu1 %v560_v9  ;;  %440 = vadd.xlane.f32.xlu0 %v439_v10 }
  0xa6   : > { %525 = vadd.xlane.f32.xlu2 %v524_v11 }
  0xad   : > { %528 = vadd.xlane.f32.xlu1 %v527_v17  ;;  %443 = vadd.xlane.f32.xlu0 %v442_v19 }
  0xae   : > { %437 = vadd.xlane.f32.xlu2 %v436_v20 }
  0xb5   : > { %446 = vadd.xlane.f32.xlu1 %v445_v24 }
  0xb6   : > { %531 = vadd.xlane.f32.xlu2 %v530_v25 }
  0xff   : > { %v553_v28 = vpop.xlane.xlu0 %552 }
 0x100   : > { %v517_v27 = vpop.xlane.xlu1 %516  ;;  %v575_v29 = vmul.f32 %v553_v28, %v1585_v26 }
 0x101   : > { %v563_v18 = vmul.f32 %v517_v27, %v1585_v26 }
 0x102   : > { %v1693_v36 = vadd.f32 1e-05, %v575_v29 }
 0x103   : > { %v579_v35 = vadd.f32 1e-05, %v563_v18 }
 0x104   : > { %vm721_vm2 = vweird.f32 %v1693_v36 }
 0x105   : > { %1428 = vrsqrt.f32 %v579_v35  ;;  %vm601_vm5 = vweird.f32 %v579_v35 }
 0x106   : > { %1430 = vrsqrt.f32 %v1693_v36 }
 0x107   : > { %v435_v41 = vpop.xlane.xlu0 %434 }
 0x108   : > { %v556_v40 = vpop.xlane.xlu1 %555  ;;  %v520_v46 = vpop.xlane.xlu2 %519  ;;  %v474_v48 = vmul.f32 %v1585_v26, %v435_v41 }
 0x109   : > { %v576_v42 = vmul.f32 %v556_v40, %v1585_v26  ;;  %v564_v49 = vmul.f32 %v520_v46, %v1585_v26 }
 0x10a   : > { %v1715_v52 = vsub.f32 %v1603_v43, %v474_v48 }
 0x10b   : > { %v1429_v50 = vpop.eup %1428  ;;  %v1712_v51 = vadd.f32 1e-05, %v576_v42  ;;  %v1717_v55 = vadd.f32 1e-05, %v564_v49 }
 0x10c   : > { %v1431_v53 = vpop.eup %1430  ;;  %v596_v54 = vmul.f32 %v1429_v50, %v579_v35  ;;  %v506_v58 = vmul.f32 %v1715_v52, %v1715_v52  ;;  %vm602_vm3 = vweird.f32 %v1429_v50 }
 0x10d   : > { %v716_v56 = vmul.f32 %v1431_v53, %v1693_v36  ;;  %1432 = vrsqrt.f32 %v1712_v51  ;;  %vm722_vm4 = vweird.f32 %v1431_v53  ;;  %vm1739_vm6 = vmor %vm601_vm5, %vm602_vm3  ;;  %vm731_vm8 = vweird.f32 %v1712_v51 }
 0x10e   : > { %v597_v57 = vmul.f32 %v1429_v50, %v596_v54  ;;  %1434 = vrsqrt.f32 %v1717_v55  ;;  %v536_v43 = vsel %vm411_vm0, %v506_v58, 0.0  ;;  %vm1748_vm7 = vmor %vm721_vm2, %vm722_vm4  ;;  %vm611_vm9 = vweird.f32 %v1717_v55 }
 0x10f   : > { %v717_v62 = vmul.f32 %v1431_v53, %v716_v56  ;;  %537 = vadd.xlane.f32.xlu0 %v536_v43 }
 0x110   : > { %v598_v63 = vmul.f32 0.5, %v597_v57  ;;  %v523_v1 = vpop.xlane.xlu1 %522  ;;  %v559_v2 = vpop.xlane.xlu0 %558 }
 0x111   : > { %v718_v3 = vmul.f32 0.5, %v717_v62  ;;  %v565_v4 = vmul.f32 %v523_v1, %v1585_v26  ;;  %v432_v5 = vpop.xlane.xlu2 %431  ;;  %v577_v6 = vmul.f32 %v559_v2, %v1585_v26 }
 0x112   : > { %v599_v9 = vsub.f32 1.5, %v598_v63  ;;  %v473_v10 = vmul.f32 %v1585_v26, %v432_v5 }
 0x113   : > { %v1433_v11 = vpop.eup %1432  ;;  %v719_v12 = vsub.f32 1.5, %v718_v3  ;;  %v1729_v13 = vadd.f32 1e-05, %v565_v4  ;;  %v1731_v14 = vadd.f32 1e-05, %v577_v6 }
 0x114   : > { %v1435_v17 = vpop.eup %1434  ;;  %v600_v19 = vmul.f32 %v1429_v50, %v599_v9  ;;  %v726_v20 = vmul.f32 %v1433_v11, %v1712_v51  ;;  %v1735_v23 = vsub.f32 %v1627_v60, %v473_v10  ;;  %vm732_vm10 = vweird.f32 %v1433_v11 }
 0x115   : > { %v720_v24 = vmul.f32 %v1431_v53, %v719_v12  ;;  %v606_v25 = vmul.f32 %v1435_v17, %v1717_v55  ;;  %1436 = vrsqrt.f32 %v1729_v13  ;;  %vm612_vm11 = vweird.f32 %v1435_v17  ;;  %vm733_vm12 = vmor %vm731_vm8, %vm732_vm10 }
 0x116   : > { %v727_v28 = vmul.f32 %v1433_v11, %v726_v20  ;;  %1438 = vrsqrt.f32 %v1731_v14  ;;  %v604_v18 = vsel %vm1739_vm6, %v1429_v50, %v600_v19  ;;  %v505_v37 = vmul.f32 %v1735_v23, %v1735_v23  ;;  %vm613_vm14 = vmor %vm611_vm9, %vm612_vm11  ;;  %v1804_v20 = vld [vmem:[%s2126_s2] ss:$0 sm:$0xff] }
 0x117   : > { %v607_v29 = vmul.f32 %v1435_v17, %v606_v25  ;;  %v724_v30 = vsel %vm1748_vm7, %v1431_v53, %v720_v24  ;;  %v755_v46 = vmul.f32 %v604_v18, %v1591_v33  ;;  %v1766_v53 = vld [vmem:[%s2125_s1] ss:$0 sm:$0xff]  ;;  %vm741_vm13 = vweird.f32 %v1731_v14 }
 0x118   : > { %v728_v31 = vmul.f32 0.5, %v727_v28  ;;  %v562_v35 = vpop.xlane.xlu1 %561  ;;  %v441_v38 = vpop.xlane.xlu0 %440  ;;  %v533_v50 = vsel %vm411_vm0, %v505_v37, 0.0  ;;  %v767_v56 = vmul.f32 %v724_v30, %v1589_v32  ;;  %vm621_vm2 = vweird.f32 %v1729_v13 }
 0x119   : > { %v608_v36 = vmul.f32 0.5, %v607_v29  ;;  %v578_v40 = vmul.f32 %v562_v35, %v1585_v26  ;;  %v526_v41 = vpop.xlane.xlu2 %525  ;;  %v476_v42 = vmul.f32 %v1585_v26, %v441_v38  ;;  %534 = vadd.xlane.f32.xlu2 %v533_v50 }
 0x11a   : > { %v729_v48 = vsub.f32 1.5, %v728_v31  ;;  %v566_v49 = vmul.f32 %v526_v41, %v1585_v26  ;;  %v786_v9 = vmul.f32 %v1766_v53, %v767_v56 }
 0x11b   : > { %v1768_v54 = vpop.eup %1436  ;;  %v609_v57 = vsub.f32 1.5, %v608_v36  ;;  %v1771_v58 = vadd.f32 1e-05, %v578_v40  ;;  %v1780_v43 = vsub.f32 %v1646_v7, %v476_v42  ;;  %v774_v7 = vmul.f32 %v1766_v53, %v755_v46 }
 0x11c   : > { %v1773_v33 = vpop.eup %1438  ;;  %v730_v62 = vmul.f32 %v1433_v11, %v729_v48  ;;  %v616_v63 = vmul.f32 %v1768_v54, %v1729_v13  ;;  %v1777_v1 = vadd.f32 1e-05, %v566_v49  ;;  %vm622_vm15 = vweird.f32 %v1768_v54 }
 0x11d   : > { %v610_v32 = vmul.f32 %v1435_v17, %v609_v57  ;;  %v736_v2 = vmul.f32 %v1773_v33, %v1731_v14  ;;  %1440 = vrsqrt.f32 %v1771_v58  ;;  %vm742_vm1 = vweird.f32 %v1773_v33  ;;  %vm1849_vm6 = vmor %vm621_vm2, %vm622_vm15 }
 0x11e   : > { %v734_v3 = vsel %vm733_vm12, %v1433_v11, %v730_v62  ;;  %v617_v4 = vmul.f32 %v1768_v54, %v616_v63  ;;  %1442 = vrsqrt.f32 %v1777_v1  ;;  %v508_v11 = vmul.f32 %v1780_v43, %v1780_v43  ;;  %vm1839_vm3 = vmor %vm741_vm13, %vm742_vm1 }
 0x11f   : > { %v768_v51 = vmul.f32 %v734_v3, %v1605_v44  ;;  %v614_v5 = vsel %vm613_vm14, %v1435_v17, %v610_v32  ;;  %v737_v6 = vmul.f32 %v1773_v33, %v736_v2  ;;  %v805_v41 = vadd.f32 %v1804_v20, %v786_v9 }
 0x120   : > { %v756_v10 = vmul.f32 %v614_v5, %v1607_v45  ;;  %v618_v12 = vmul.f32 0.5, %v617_v4  ;;  %v529_v55 = vpop.xlane.xlu1 %528  ;;  %v444_v19 = vpop.xlane.xlu0 %443  ;;  %v542_v18 = vsel %vm411_vm0, %v508_v11, 0.0  ;;  %vm751_vm4 = vweird.f32 %v1771_v58 }
 0x121   : > { %v738_v44 = vmul.f32 0.5, %v737_v6  ;;  %v567_v17 = vmul.f32 %v529_v55, %v1585_v26  ;;  %v438_v24 = vpop.xlane.xlu2 %437  ;;  %v477_v25 = vmul.f32 %v1585_v26, %v444_v19  ;;  %v787_v45 = vmul.f32 %v1766_v53, %v768_v51  ;;  %543 = vadd.xlane.f32.xlu2 %v542_v18 }
 0x122   : > { %v619_v27 = vsub.f32 1.5, %v618_v12  ;;  %v475_v28 = vmul.f32 %v1585_v26, %v438_v24  ;;  %v775_v60 = vmul.f32 %v1766_v53, %v756_v10  ;;  %vm631_vm9 = vweird.f32 %v1777_v1 }
 0x123   : > { %v1812_v29 = vpop.eup %1440  ;;  %v739_v30 = vsub.f32 1.5, %v738_v44  ;;  %v1815_v31 = vadd.f32 1e-05, %v567_v17  ;;  %v806_v35 = vadd.f32 %v1804_v20, %v787_v45  ;;  %v1824_v40 = vsub.f32 %v1658_v15, %v477_v25 }
 0x124   : > { %v1443_v37 = vpop.eup %1442  ;;  %v746_v38 = vmul.f32 %v1812_v29, %v1771_v58  ;;  %v1821_v36 = vsub.f32 %v1662_v16, %v475_v28  ;;  %v620_v42 = vmul.f32 %v1768_v54, %v619_v27  ;;  %v793_v16 = vadd.f32 %v1804_v20, %v774_v7 }
 0x125   : > { %v740_v46 = vmul.f32 %v1773_v33, %v739_v30  ;;  %v626_v48 = vmul.f32 %v1443_v37, %v1777_v1  ;;  %1444 = vrsqrt.f32 %v1815_v31  ;;  %v794_v50 = vadd.f32 %v1804_v20, %v775_v60 }
 0x126   : > { %v747_v49 = vmul.f32 %v1812_v29, %v746_v38  ;;  %vm752_vm5 = vweird.f32 %v1812_v29  ;;  %v1845_v13 = vpack.c.bf16 %v806_v35, %v805_v41  ;;  %v507_v2 = vmul.f32 %v1821_v36, %v1821_v36 }
 0x127   : > { %v627_v56 = vmul.f32 %v1443_v37, %v626_v48  ;;  %v744_v14 = vsel %vm1839_vm3, %v1773_v33, %v740_v46  ;;  %v809_v63 = vpack.c.bf16 %v794_v50, %v793_v16  ;;  %v624_v3 = vsel %vm1849_vm6, %v1768_v54, %v620_v42  ;;  %vm753_vm8 = vmor %vm751_vm4, %vm752_vm5 }
 0x128   : > { %v748_v62 = vmul.f32 0.5, %v747_v49  ;;  %v447_v32 = vpop.xlane.xlu1 %446  ;;  %1347 = vmatmul.msk.bf16.vlgmr.msra.gmra.mxu3 %vm411_vm0, %v1845_v13  ;;  %v509_v33 = vmul.f32 %v1824_v40, %v1824_v40  ;;  %vm632_vm7 = vweird.f32 %v1443_v37  ;;  %v539_v6 = vsel %vm411_vm0, %v507_v2, 0.0 }
 0x129   : > { %v628_v4 = vmul.f32 0.5, %v627_v56  ;;  %v478_v7 = vmul.f32 %v1585_v26, %v447_v32  ;;  %v532_v51 = vpop.xlane.xlu2 %531  ;;  %1341 = vmatmul.msk.bf16.vlgmr.msra.gmra.mxu0 %vm411_vm0, %v809_v63  ;;  %1357 = vmatmul.msk.bf16.vlgmr.msra.gmra.mxu1 %vm411_vm0, %v809_v63  ;;  %v769_v10 = vmul.f32 %v744_v14, %v1624_v59  ;;  %v757_v19 = vmul.f32 %v624_v3, %v1609_v47  ;;  %vm633_vm10 = vmor %vm631_vm9, %vm632_vm7 }
 0x12a   : > { %v749_v5 = vsub.f32 1.5, %v748_v62  ;;  %v568_v54 = vmul.f32 %v532_v51, %v1585_v26  ;;  %1373 = vmatmul.msk.bf16.vlgmr.msra.gmra.mxu2 %vm411_vm0, %v809_v63  ;;  %540 = vadd.xlane.f32.xlu1 %v539_v6  ;;  %v545_v11 = vsel %vm411_vm0, %v509_v33, 0.0  ;;  %vm641_vm11 = vweird.f32 %v1815_v31 }
 0x12b   : > { %v1445_v9 = vpop.eup %1444  ;;  %v629_v12 = vsub.f32 1.5, %v628_v4  ;;  %v1873_v55 = vsub.f32 %v1673_v22, %v478_v7  ;;  %546 = vadd.xlane.f32.xlu0 %v545_v11  ;;  %1397 = vmatpush.bf16.msra.mxu3 %v1691_v34  ;;  %v788_v27 = vmul.f32 %v1766_v53, %v769_v10  ;;  %v776_v1 = vmul.f32 %v1766_v53, %v757_v19 }
 0x12c   : > { %v750_v44 = vmul.f32 %v1812_v29, %v749_v5  ;;  %v636_v17 = vmul.f32 %v1445_v9, %v1815_v31  ;;  %v584_v24 = vadd.f32 1e-05, %v568_v54  ;;  %vm642_vm12 = vweird.f32 %v1445_v9 }
 0x12d   : > { %v630_v59 = vmul.f32 %v1443_v37, %v629_v12  ;;  %v510_v22 = vmul.f32 %v1873_v55, %v1873_v55  ;;  %vm643_vm13 = vmor %vm641_vm11, %vm642_vm12 }
 0x12e   : > { %v754_v47 = vsel %vm753_vm8, %v1812_v29, %v750_v44  ;;  %v637_v25 = vmul.f32 %v1445_v9, %v636_v17  ;;  %1446 = vrsqrt.f32 %v584_v24  ;;  %vm651_vm14 = vweird.f32 %v584_v24 }
 0x12f   : > { %v770_v45 = vmul.f32 %v754_v47, %v1629_v61  ;;  %v634_v34 = vsel %vm633_vm10, %v1443_v37, %v630_v59  ;;  %v548_v18 = vsel %vm411_vm0, %v510_v22, 0.0  ;;  %1398 = vmatpush.bf16.msra.mxu3 %v1705_v39  ;;  %v807_v61 = vadd.f32 %v1804_v20, %v788_v27 }
 0x130   : > { %v758_v58 = vmul.f32 %v634_v34, %v1635_v0  ;;  %v638_v28 = vmul.f32 0.5, %v637_v25  ;;  %v795_v0 = vadd.f32 %v1804_v20, %v776_v1  ;;  %vm922_vm8 = vcmask 257024  }
 0x131   : > { %v789_v60 = vmul.f32 %v1766_v53, %v770_v45 }
 0x132   : > { %v639_v29 = vsub.f32 1.5, %v638_v28  ;;  %v777_v30 = vmul.f32 %v1766_v53, %v758_v58  ;;  %549 = vadd.xlane.f32.xlu1 %v548_v18 }
 0x133   : > { %v808_v35 = vadd.f32 %v1804_v20, %v789_v60 }
 0x134   : > { %v1447_v37 = vpop.eup %1446  ;;  %v796_v38 = vadd.f32 %v1804_v20, %v777_v30  ;;  %v640_v41 = vmul.f32 %v1445_v9, %v639_v29 }
 0x135   : > { %v646_v39 = vmul.f32 %v1447_v37, %v584_v24  ;;  %v816_v42 = vpack.c.bf16 %v808_v35, %v807_v61  ;;  %vm652_vm15 = vweird.f32 %v1447_v37 }
 0x136   : > { %v810_v46 = vpack.c.bf16 %v796_v38, %v795_v0  ;;  %v644_v49 = vsel %vm643_vm13, %v1445_v9, %v640_v41  ;;  %vm653_vm1 = vmor %vm651_vm14, %vm652_vm15 }
 0x137   : > { %v647_v48 = vmul.f32 %v1447_v37, %v646_v39  ;;  %v759_v50 = vmul.f32 %v644_v49, %v1649_v8 }
 0x138   : > { %1348 = vmatmul.msk.bf16.gmra.mxu3 %vm411_vm0, %v816_v42 }
 0x139   : > { %v648_v16 = vmul.f32 0.5, %v647_v48  ;;  %1342 = vmatmul.msk.bf16.gmra.mxu0 %vm411_vm0, %v810_v46  ;;  %1358 = vmatmul.msk.bf16.gmra.mxu1 %vm411_vm0, %v810_v46  ;;  %v778_v14 = vmul.f32 %v1766_v53, %v759_v50 }
 0x13a   : > { %1374 = vmatmul.msk.bf16.gmra.mxu2 %vm411_vm0, %v810_v46 }
 0x13b   : > { %v649_v31 = vsub.f32 1.5, %v648_v16  ;;  %v797_v63 = vadd.f32 %v1804_v20, %v778_v14 }
 0x13d   : > { %v650_v15 = vmul.f32 %v1447_v37, %v649_v31 }
 0x13f   : > { %v654_v56 = vsel %vm653_vm1, %v1447_v37, %v650_v15 }
 0x140   : > { %v760_v57 = vmul.f32 %v654_v56, %v1670_v21 }
 0x142   : > { %v779_v62 = vmul.f32 %v1766_v53, %v760_v57 }
 0x144   : > { %v798_v32 = vadd.f32 %v1804_v20, %v779_v62 }
 0x146   : > { %v811_v2 = vpack.c.bf16 %v798_v32, %v797_v63 }
 0x148   : > { %1363 = vmatmul.msk.bf16.vlgmr.msrb.gmra.mxu3 %vm411_vm0, %v1845_v13 }
 0x149   : > { %1343 = vmatmul.msk.bf16.gmra.mxu0 %vm411_vm0, %v811_v2  ;;  %1359 = vmatmul.msk.bf16.gmra.mxu1 %vm411_vm0, %v811_v2 }
 0x14a   : > { %1375 = vmatmul.msk.bf16.gmra.mxu2 %vm411_vm0, %v811_v2 }
 0x158   : > { %1364 = vmatmul.msk.bf16.gmra.mxu3 %vm411_vm0, %v816_v42 }
 0x168   : > { %1379 = vmatmul.msk.bf16.vlgmr.msra.gmra.mxu3 %vm411_vm0, %v1845_v13 }
 0x178   : > { %1380 = vmatmul.msk.bf16.gmra.mxu3 %vm411_vm0, %v816_v42 }
 0x182   : > { %v538_v8 = vpop.xlane.xlu0 %537 }
 0x183   : > { %v570_v21 = vmul.f32 %v538_v8, %v1585_v26 }
 0x185   : > { %v586_v3 = vadd.f32 1e-05, %v570_v21 }
 0x187   : > { %1448 = vrsqrt.f32 %v586_v3  ;;  %vm671_vm2 = vweird.f32 %v586_v3 }
 0x18c   : > { %v535_v4 = vpop.xlane.xlu2 %534 }
 0x18d   : > { %v1449_v7 = vpop.eup %1448  ;;  %v569_v51 = vmul.f32 %v535_v4, %v1585_v26 }
 0x18e   : > { %v666_v33 = vmul.f32 %v1449_v7, %v586_v3  ;;  %vm672_vm3 = vweird.f32 %v1449_v7 }
 0x18f   : > { %v585_v5 = vadd.f32 1e-05, %v569_v51  ;;  %vm673_vm4 = vmor %vm671_vm2, %vm672_vm3 }
 0x190   : > { %v667_v6 = vmul.f32 %v1449_v7, %v666_v33 }
 0x191   : > { %1450 = vrsqrt.f32 %v585_v5  ;;  %vm661_vm6 = vweird.f32 %v585_v5 }
 0x192   : > { %v668_v54 = vmul.f32 0.5, %v667_v6 }
 0x194   : > { %v544_v9 = vpop.xlane.xlu2 %543  ;;  %v669_v10 = vsub.f32 1.5, %v668_v54 }
 0x195   : > { %v572_v13 = vmul.f32 %v544_v9, %v1585_v26 }
 0x196   : > { %v670_v44 = vmul.f32 %v1449_v7, %v669_v10 }
 0x197   : > { %v1451_v12 = vpop.eup %1450  ;;  %v588_v11 = vadd.f32 1e-05, %v572_v13 }
 0x198   : > { %v656_v19 = vmul.f32 %v1451_v12, %v585_v5  ;;  %v674_v22 = vsel %vm673_vm4, %v1449_v7, %v670_v44  ;;  %vm662_vm5 = vweird.f32 %v1451_v12 }
 0x199   : > { %1452 = vrsqrt.f32 %v588_v11  ;;  %v762_v28 = vmul.f32 %v674_v22, %v1715_v52  ;;  %vm663_vm7 = vmor %vm661_vm6, %vm662_vm5  ;;  %vm691_vm9 = vweird.f32 %v588_v11 }
 0x19a   : > { %v657_v17 = vmul.f32 %v1451_v12, %v656_v19 }
 0x19b   : > { %v781_v37 = vmul.f32 %v1766_v53, %v762_v28 }
 0x19c   : > { %v658_v24 = vmul.f32 0.5, %v657_v17 }
 0x19d   : > { %v541_v59 = vpop.xlane.xlu1 %540  ;;  %v800_v15 = vadd.f32 %v1804_v20, %v781_v37 }
 0x19e   : > { %v571_v47 = vmul.f32 %v541_v59, %v1585_v26  ;;  %v547_v25 = vpop.xlane.xlu0 %546  ;;  %v659_v45 = vsub.f32 1.5, %v658_v24 }
 0x19f   : > { %v573_v34 = vmul.f32 %v547_v25, %v1585_v26  ;;  %v1926_v27 = vpop.eup %1452 }
 0x1a0   : > { %v1928_v58 = vadd.f32 1e-05, %v571_v47  ;;  %v660_v18 = vmul.f32 %v1451_v12, %v659_v45  ;;  %v686_v1 = vmul.f32 %v1926_v27, %v588_v11  ;;  %vm692_vm10 = vweird.f32 %v1926_v27 }
 0x1a1   : > { %v1932_v60 = vadd.f32 1e-05, %v573_v34  ;;  %vm1973_vm11 = vmor %vm691_vm9, %vm692_vm10 }
 0x1a2   : > { %1454 = vrsqrt.f32 %v1928_v58  ;;  %v664_v29 = vsel %vm663_vm7, %v1451_v12, %v660_v18  ;;  %v687_v30 = vmul.f32 %v1926_v27, %v686_v1  ;;  %vm681_vm13 = vweird.f32 %v1928_v58 }
 0x1a3   : > { %1456 = vrsqrt.f32 %v1932_v60  ;;  %v761_v61 = vmul.f32 %v664_v29, %v1735_v23  ;;  %vm701_vm15 = vweird.f32 %v1932_v60 }
 0x1a4   : > { %v688_v52 = vmul.f32 0.5, %v687_v30 }
 0x1a5   : > { %v550_v35 = vpop.xlane.xlu1 %549  ;;  %v780_v39 = vmul.f32 %v1766_v53, %v761_v61 }
 0x1a6   : > { %v574_v0 = vmul.f32 %v550_v35, %v1585_v26  ;;  %v866_v38 = vpop.f32.mrf.mxu0  ;;  %v964_v41 = vpop.f32.mrf.mxu1  ;;  %v689_v42 = vsub.f32 1.5, %v688_v52 }
 0x1a7   : > { %v906_v46 = vpack.c.bf16 %v866_v38, %v866_v38  ;;  %v1004_v26 = vpack.c.bf16 %v964_v41, %v964_v41  ;;  %v799_v49 = vadd.f32 %v1804_v20, %v780_v39 }
 0x1a8   : > { %v1455_v23 = vpop.eup %1454  ;;  %v1956_v48 = vadd.f32 1e-05, %v574_v0  ;;  %v690_v31 = vmul.f32 %v1926_v27, %v689_v42 }
 0x1a9   : > { %v1959_v16 = vpop.eup %1456  ;;  %v676_v50 = vmul.f32 %v1455_v23, %v1928_v58  ;;  %923 = vst.msk [vmem:[%s1947_s27] sm:$0xf] %vm922_vm8, %v906_v46  ;;  %v812_v14 = vpack.c.bf16 %v800_v15, %v799_v49  ;;  %vm682_vm12 = vweird.f32 %v1455_v23 }
 0x1aa   : > { %v696_v56 = vmul.f32 %v1959_v16, %v1932_v60  ;;  %1458 = vrsqrt.f32 %v1956_v48  ;;  %1020 = vst.msk [vmem:[%s1954_s16] sm:$0xf] %vm922_vm8, %v1004_v26  ;;  %v694_v2 = vsel %vm1973_vm11, %v1926_v27, %v690_v31  ;;  %vm683_vm14 = vmor %vm681_vm13, %vm682_vm12  ;;  %vm702_vm1 = vweird.f32 %v1959_v16 }
 0x1ab   : > { %v677_v57 = vmul.f32 %v1455_v23, %v676_v50  ;;  %v896_v62 = vpop.f32.mrf.mxu3  ;;  %1344 = vmatmul.msk.bf16.gmra.mxu0 %vm411_vm0, %v812_v14  ;;  %1360 = vmatmul.msk.bf16.gmra.mxu1 %vm411_vm0, %v812_v14  ;;  %v764_v9 = vmul.f32 %v694_v2, %v1780_v43  ;;  %vm711_vm2 = vweird.f32 %v1956_v48  ;;  %vm2018_vm4 = vmor %vm701_vm15, %vm702_vm1 }
 0x1ac   : > { %v918_v32 = vpack.c.bf16 %v896_v62, %v896_v62  ;;  %v697_v3 = vmul.f32 %v1959_v16, %v696_v56  ;;  %1376 = vmatmul.msk.bf16.gmra.mxu2 %vm411_vm0, %v812_v14 }
 0x1ad   : > { %v678_v8 = vmul.f32 0.5, %v677_v57  ;;  %v1061_v21 = vpop.f32.mrf.mxu2  ;;  %v783_v24 = vmul.f32 %v1766_v53, %v764_v9 }
 0x1ae   : > { %935 = vst.msk [vmem:[%s1947_s27 + $0x30] sm:$0xf] %vm922_vm8, %v918_v32  ;;  %v1101_v4 = vpack.c.bf16 %v1061_v21, %v1061_v21  ;;  %v868_v7 = vpop.f32.mrf.mxu0  ;;  %v966_v51 = vpop.f32.mrf.mxu1  ;;  %v698_v12 = vmul.f32 0.5, %v697_v3 }
 0x1af   : > { %v679_v33 = vsub.f32 1.5, %v678_v8  ;;  %v907_v5 = vpack.c.bf16 %v868_v7, %v868_v7  ;;  %v1005_v6 = vpack.c.bf16 %v966_v51, %v966_v51  ;;  %v802_v1 = vadd.f32 %v1804_v20, %v783_v24 }
 0x1b0   : > { %v1459_v54 = vpop.eup %1458  ;;  %1117 = vst.msk [vmem:[%s1986_s19] sm:$0xf] %vm922_vm8, %v1101_v4  ;;  %v699_v47 = vsub.f32 1.5, %v698_v12 }
 0x1b1   : > { %v680_v10 = vmul.f32 %v1455_v23, %v679_v33  ;;  %v706_v13 = vmul.f32 %v1459_v54, %v1956_v48  ;;  %924 = vst.msk [vmem:[%s1947_s27 + $0x4] sm:$0xf] %vm922_vm8, %v907_v5  ;;  %vm712_vm3 = vweird.f32 %v1459_v54 }
 0x1b2   : > { %1021 = vst.msk [vmem:[%s1954_s16 + $0x4] sm:$0xf] %vm922_vm8, %v1005_v6  ;;  %v700_v30 = vmul.f32 %v1959_v16, %v699_v47  ;;  %vm713_vm5 = vmor %vm711_vm2, %vm712_vm3 }
 0x1b3   : > { %v684_v11 = vsel %vm683_vm14, %v1455_v23, %v680_v10  ;;  %v707_v19 = vmul.f32 %v1459_v54, %v706_v13  ;;  %v898_v44 = vpop.f32.mrf.mxu3 }
 0x1b4   : > { %v763_v17 = vmul.f32 %v684_v11, %v1821_v36  ;;  %v919_v43 = vpack.c.bf16 %v898_v44, %v898_v44  ;;  %v704_v60 = vsel %vm2018_vm4, %v1959_v16, %v700_v30 }
 0x1b5   : > { %v708_v59 = vmul.f32 0.5, %v707_v19  ;;  %v1063_v22 = vpop.f32.mrf.mxu2  ;;  %v765_v48 = vmul.f32 %v704_v60, %v1824_v40 }
 0x1b6   : > { %936 = vst.msk [vmem:[%s1947_s27 + $0x34] sm:$0xf] %vm922_vm8, %v919_v43  ;;  %v1102_v25 = vpack.c.bf16 %v1063_v22, %v1063_v22  ;;  %v871_v45 = vpop.f32.mrf.mxu0  ;;  %v969_v34 = vpop.f32.mrf.mxu1  ;;  %v782_v27 = vmul.f32 %v1766_v53, %v763_v17 }
 0x1b7   : > { %v709_v36 = vsub.f32 1.5, %v708_v59  ;;  %v908_v58 = vpack.c.bf16 %v871_v45, %v871_v45  ;;  %v1006_v28 = vpack.c.bf16 %v969_v34, %v969_v34 }
 0x1b8   : > { %1118 = vst.msk [vmem:[%s1986_s19 + $0x4] sm:$0xf] %vm922_vm8, %v1102_v25  ;;  %v801_v18 = vadd.f32 %v1804_v20, %v782_v27 }
 0x1b9   : > { %v710_v29 = vmul.f32 %v1459_v54, %v709_v36  ;;  %925 = vst.msk [vmem:[%s1947_s27 + $0x8] sm:$0xf] %vm922_vm8, %v908_v58 }
 0x1ba   : > { %1022 = vst.msk [vmem:[%s1954_s16 + $0x8] sm:$0xf] %vm922_vm8, %v1006_v28  ;;  %v813_v52 = vpack.c.bf16 %v802_v1, %v801_v18 }
 0x1bb   : > { %v901_v35 = vpop.f32.mrf.mxu3  ;;  %v714_v37 = vsel %vm713_vm5, %v1459_v54, %v710_v29 }
 0x1bc   : > { %v920_v0 = vpack.c.bf16 %v901_v35, %v901_v35  ;;  %1345 = vmatmul.msk.bf16.gmra.mxu0 %vm411_vm0, %v813_v52  ;;  %1361 = vmatmul.msk.bf16.gmra.mxu1 %vm411_vm0, %v813_v52  ;;  %v766_v46 = vmul.f32 %v714_v37, %v1873_v55  ;;  %v784_v55 = vmul.f32 %v1766_v53, %v765_v48 }
 0x1bd   : > { %v1066_v38 = vpop.f32.mrf.mxu2  ;;  %1377 = vmatmul.msk.bf16.gmra.mxu2 %vm411_vm0, %v813_v52 }
 0x1be   : > { %937 = vst.msk [vmem:[%s1947_s27 + $0x38] sm:$0xf] %vm922_vm8, %v920_v0  ;;  %v1103_v41 = vpack.c.bf16 %v1066_v38, %v1066_v38  ;;  %v873_v39 = vpop.f32.mrf.mxu0  ;;  %v971_v42 = vpop.f32.mrf.mxu1  ;;  %v785_v16 = vmul.f32 %v1766_v53, %v766_v46  ;;  %v803_v63 = vadd.f32 %v1804_v20, %v784_v55 }
 0x1bf   : > { %v909_v26 = vpack.c.bf16 %v873_v39, %v873_v39  ;;  %v1007_v23 = vpack.c.bf16 %v971_v42, %v971_v42 }
 0x1c0   : > { %1119 = vst.msk [vmem:[%s1986_s19 + $0x8] sm:$0xf] %vm922_vm8, %v1103_v41  ;;  %v804_v62 = vadd.f32 %v1804_v20, %v785_v16 }
 0x1c1   : > { %926 = vst.msk [vmem:[%s1947_s27 + $0xc] sm:$0xf] %vm922_vm8, %v909_v26 }
 0x1c2   : > { %1023 = vst.msk [vmem:[%s1954_s16 + $0xc] sm:$0xf] %vm922_vm8, %v1007_v23  ;;  %v814_v53 = vpack.c.bf16 %v804_v62, %v803_v63 }
 0x1c3   : > { %v903_v49 = vpop.f32.mrf.mxu3 }
 0x1c4   : > { %v921_v31 = vpack.c.bf16 %v903_v49, %v903_v49 }
 0x1c5   : > { %v1068_v50 = vpop.f32.mrf.mxu2 }
 0x1c6   : > { %938 = vst.msk [vmem:[%s1947_s27 + $0x3c] sm:$0xf] %vm922_vm8, %v921_v31  ;;  %v1104_v15 = vpack.c.bf16 %v1068_v50, %v1068_v50  ;;  %v876_v56 = vpop.f32.mrf.mxu0  ;;  %v974_v57 = vpop.f32.mrf.mxu1 }
 0x1c7   : > { %v910_v40 = vpack.c.bf16 %v876_v56, %v876_v56  ;;  %v1008_v14 = vpack.c.bf16 %v974_v57, %v974_v57 }
 0x1c8   : > { %1120 = vst.msk [vmem:[%s1986_s19 + $0xc] sm:$0xf] %vm922_vm8, %v1104_v15 }
 0x1c9   : > { %927 = vst.msk [vmem:[%s1947_s27 + $0x10] sm:$0xf] %vm922_vm8, %v910_v40 }
 0x1ca   : > { %1024 = vst.msk [vmem:[%s1954_s16 + $0x10] sm:$0xf] %vm922_vm8, %v1008_v14 }
 0x1cb   : > { %v994_v32 = vpop.f32.mrf.mxu3 }
 0x1cc   : > { %v1016_v2 = vpack.c.bf16 %v994_v32, %v994_v32  ;;  %1346 = vmatmul.msk.bf16.gmra.mxu0 %vm411_vm0, %v814_v53  ;;  %1362 = vmatmul.msk.bf16.gmra.mxu1 %vm411_vm0, %v814_v53 }
 0x1cd   : > { %v1071_v8 = vpop.f32.mrf.mxu2  ;;  %1378 = vmatmul.msk.bf16.gmra.mxu2 %vm411_vm0, %v814_v53 }
 0x1ce   : > { %1032 = vst.msk [vmem:[%s1954_s16 + $0x30] sm:$0xf] %vm922_vm8, %v1016_v2  ;;  %v1105_v21 = vpack.c.bf16 %v1071_v8, %v1071_v8  ;;  %v878_v20 = vpop.f32.mrf.mxu0  ;;  %v976_v3 = vpop.f32.mrf.mxu1 }
 0x1cf   : > { %v911_v4 = vpack.c.bf16 %v878_v20, %v878_v20  ;;  %v1009_v7 = vpack.c.bf16 %v976_v3, %v976_v3 }
 0x1d0   : > { %1121 = vst.msk [vmem:[%s1986_s19 + $0x10] sm:$0xf] %vm922_vm8, %v1105_v21 }
 0x1d1   : > { %928 = vst.msk [vmem:[%s1947_s27 + $0x14] sm:$0xf] %vm922_vm8, %v911_v4 }
 0x1d2   : > { %1025 = vst.msk [vmem:[%s1954_s16 + $0x14] sm:$0xf] %vm922_vm8, %v1009_v7 }
 0x1d3   : > { %v996_v51 = vpop.f32.mrf.mxu3 }
 0x1d4   : > { %v1017_v33 = vpack.c.bf16 %v996_v51, %v996_v51 }
 0x1d5   : > { %v1073_v5 = vpop.f32.mrf.mxu2 }
 0x1d6   : > { %1033 = vst.msk [vmem:[%s1954_s16 + $0x34] sm:$0xf] %vm922_vm8, %v1017_v33  ;;  %v1106_v6 = vpack.c.bf16 %v1073_v5, %v1073_v5 }
 0x1d8   : > { %1122 = vst.msk [vmem:[%s1986_s19 + $0x14] sm:$0xf] %vm922_vm8, %v1106_v6 }
 0x1db   : > { %v999_v54 = vpop.f32.mrf.mxu3 }
 0x1dc   : > { %v1018_v9 = vpack.c.bf16 %v999_v54, %v999_v54 }
 0x1de   : > { %1034 = vst.msk [vmem:[%s1954_s16 + $0x38] sm:$0xf] %vm922_vm8, %v1018_v9 }
 0x1e3   : > { %v1001_v10 = vpop.f32.mrf.mxu3 }
 0x1e4   : > { %v1019_v13 = vpack.c.bf16 %v1001_v10, %v1001_v10 }
 0x1e6   : > { %1035 = vst.msk [vmem:[%s1954_s16 + $0x3c] sm:$0xf] %vm922_vm8, %v1019_v13 }
 0x1eb   : > { %v1091_v12 = vpop.f32.mrf.mxu3 }
 0x1ec   : > { %v1113_v11 = vpack.c.bf16 %v1091_v12, %v1091_v12 }
 0x1ee   : > { %1129 = vst.msk [vmem:[%s1986_s19 + $0x30] sm:$0xf] %vm922_vm8, %v1113_v11 }
 0x1f3   : > { %v1093_v19 = vpop.f32.mrf.mxu3 }
 0x1f4   : > { %v1114_v44 = vpack.c.bf16 %v1093_v19, %v1093_v19 }
 0x1f6   : > { %1130 = vst.msk [vmem:[%s1986_s19 + $0x34] sm:$0xf] %vm922_vm8, %v1114_v44 }
 0x1fb   : > { %v1096_v17 = vpop.f32.mrf.mxu3 }
 0x1fc   : > { %v1115_v43 = vpack.c.bf16 %v1096_v17, %v1096_v17 }
 0x1fe   : > { %1131 = vst.msk [vmem:[%s1986_s19 + $0x38] sm:$0xf] %vm922_vm8, %v1115_v43 }
 0x203   : > { %v1098_v24 = vpop.f32.mrf.mxu3 }
 0x204   : > { %v1116_v59 = vpack.c.bf16 %v1098_v24, %v1098_v24 }
 0x206   : > { %1132 = vst.msk [vmem:[%s1986_s19 + $0x3c] sm:$0xf] %vm922_vm8, %v1116_v59 }
 0x228   : > { %v881_v22 = vpop.f32.mrf.mxu0  ;;  %v979_v47 = vpop.f32.mrf.mxu1 }
 0x229   : > { %v912_v25 = vpack.c.bf16 %v881_v22, %v881_v22  ;;  %v1010_v45 = vpack.c.bf16 %v979_v47, %v979_v47 }
 0x22b   : > { %929 = vst.msk [vmem:[%s1947_s27 + $0x18] sm:$0xf] %vm922_vm8, %v912_v25 }
 0x22c   : > { %1026 = vst.msk [vmem:[%s1954_s16 + $0x18] sm:$0xf] %vm922_vm8, %v1010_v45 }
 0x22f   : > { %v1076_v34 = vpop.f32.mrf.mxu2 }
 0x230   : > { %v1107_v27 = vpack.c.bf16 %v1076_v34, %v1076_v34  ;;  %v883_v36 = vpop.f32.mrf.mxu0  ;;  %v981_v58 = vpop.f32.mrf.mxu1 }
 0x231   : > { %v913_v28 = vpack.c.bf16 %v883_v36, %v883_v36  ;;  %v1011_v18 = vpack.c.bf16 %v981_v58, %v981_v58 }
 0x232   : > { %1123 = vst.msk [vmem:[%s1986_s19 + $0x18] sm:$0xf] %vm922_vm8, %v1107_v27 }
 0x233   : > { %930 = vst.msk [vmem:[%s1947_s27 + $0x1c] sm:$0xf] %vm922_vm8, %v913_v28 }
 0x234   : > { %1027 = vst.msk [vmem:[%s1954_s16 + $0x1c] sm:$0xf] %vm922_vm8, %v1011_v18 }
 0x237   : > { %v1078_v1 = vpop.f32.mrf.mxu2 }
 0x238   : > { %v1108_v29 = vpack.c.bf16 %v1078_v1, %v1078_v1 }
 0x239   : > { %v886_v30 = vpop.f32.mrf.mxu0  ;;  %v984_v61 = vpop.f32.mrf.mxu1 }
 0x23a   : > { %v914_v52 = vpack.c.bf16 %v886_v30, %v886_v30  ;;  %v1012_v35 = vpack.c.bf16 %v984_v61, %v984_v61  ;;  %1124 = vst.msk [vmem:[%s1986_s19 + $0x1c] sm:$0xf] %vm922_vm8, %v1108_v29 }
 0x23c   : > { %931 = vst.msk [vmem:[%s1947_s27 + $0x20] sm:$0xf] %vm922_vm8, %v914_v52 }
 0x23d   : > { %1028 = vst.msk [vmem:[%s1954_s16 + $0x20] sm:$0xf] %vm922_vm8, %v1012_v35 }
 0x240   : > { %v1081_v37 = vpop.f32.mrf.mxu2 }
 0x241   : > { %v1109_v0 = vpack.c.bf16 %v1081_v37, %v1081_v37  ;;  %v888_v38 = vpop.f32.mrf.mxu0  ;;  %v986_v60 = vpop.f32.mrf.mxu1 }
 0x242   : > { %v915_v41 = vpack.c.bf16 %v888_v38, %v888_v38  ;;  %v1013_v39 = vpack.c.bf16 %v986_v60, %v986_v60 }
 0x243   : > { %1125 = vst.msk [vmem:[%s1986_s19 + $0x20] sm:$0xf] %vm922_vm8, %v1109_v0 }
 0x244   : > { %932 = vst.msk [vmem:[%s1947_s27 + $0x24] sm:$0xf] %vm922_vm8, %v915_v41 }
 0x245   : > { %1029 = vst.msk [vmem:[%s1954_s16 + $0x24] sm:$0xf] %vm922_vm8, %v1013_v39 }
 0x248   : > { %v1083_v42 = vpop.f32.mrf.mxu2 }
 0x249   : > { %v1110_v46 = vpack.c.bf16 %v1083_v42, %v1083_v42  ;;  %v891_v26 = vpop.f32.mrf.mxu0  ;;  %v989_v23 = vpop.f32.mrf.mxu1 }
 0x24a   : > { %v916_v48 = vpack.c.bf16 %v891_v26, %v891_v26  ;;  %v1014_v49 = vpack.c.bf16 %v989_v23, %v989_v23 }
 0x24b   : > { %1126 = vst.msk [vmem:[%s1986_s19 + $0x24] sm:$0xf] %vm922_vm8, %v1110_v46 }
 0x24c   : > { %933 = vst.msk [vmem:[%s1947_s27 + $0x28] sm:$0xf] %vm922_vm8, %v916_v48 }
 0x24d   : > { %1030 = vst.msk [vmem:[%s1954_s16 + $0x28] sm:$0xf] %vm922_vm8, %v1014_v49 }
 0x250   : > { %v1086_v16 = vpop.f32.mrf.mxu2 }
 0x251   : > { %v1111_v31 = vpack.c.bf16 %v1086_v16, %v1086_v16  ;;  %v893_v50 = vpop.f32.mrf.mxu0  ;;  %v991_v55 = vpop.f32.mrf.mxu1 }
 0x252   : > { %v917_v15 = vpack.c.bf16 %v893_v50, %v893_v50  ;;  %v1015_v56 = vpack.c.bf16 %v991_v55, %v991_v55 }
 0x253   : > { %1127 = vst.msk [vmem:[%s1986_s19 + $0x28] sm:$0xf] %vm922_vm8, %v1111_v31 }
 0x254   : > { %934 = vst.msk [vmem:[%s1947_s27 + $0x2c] sm:$0xf] %vm922_vm8, %v917_v15 }
 0x255   : > { %1031 = vst.msk [vmem:[%s1954_s16 + $0x2c] sm:$0xf] %vm922_vm8, %v1015_v56 }
 0x258   : > { %v1088_v57 = vpop.f32.mrf.mxu2 }
 0x259   : > { %v1112_v40 = vpack.c.bf16 %v1088_v57, %v1088_v57 }
 0x25b   : > { %1128 = vst.msk [vmem:[%s1986_s19 + $0x2c] sm:$0xf] %vm922_vm8, %v1112_v40 }
 0x25c PF: > { %s19_s29 = sadd.s32 1, %s1482_s29   ;;  %s2145_s27 = smov %s1478_s28 }
 0x25d   : > { %p16_p5 = scmp.ge.s32.totalorder %s19_s29, 4   ;;  %s2146_s28 = smov %s2148_s30 }
 0x25f   :  { %18 = sbr.rel (!%p16_p5) target bundleno = 2 (0x2), region = 98 }

// kernel: tpu_custom_call.1
= control target key start
LH: loop header
LB: loop body
LE: loop exit
PB: predicated region body
PF: predicated region fallthrough
CT: control target
= control target key end

     0   :  { %s1530_s27 = smov 0   ;;  %s1532_s28 = smov 0   ;;  %s2124_s0 = inlined_call_operand.vmem [shape: f32[2,128,32], index: 0, kind: input, shape index: {}]   ;;  %s2125_s1 = inlined_call_operand.vmem [shape: f32[1,32], index: 1, kind: input, shape index: {}]   ;;  %s2126_s2 = inlined_call_operand.vmem [shape: f32[1,32], index: 2, kind: input, shape index: {}]   ;;  %s2127_s3 = inlined_call_operand.vmem [shape: bf16[32,32], index: 3, kind: input, shape index: {}]   ;;  %s2128_s4 = inlined_call_operand.vmem [shape: bf16[32,32], index: 4, kind: input, shape index: {}]   ;;  %s2129_s5 = inlined_call_operand.vmem [shape: bf16[32,32], index: 5, kind: input, shape index: {}]   ;;  %s2130_s6 = inlined_call_operand.vmem [shape: bf16[2,128,32], index: 6, kind: output, shape index: {0}]   ;;  %s2131_s7 = inlined_call_operand.vmem [shape: bf16[2,128,32], index: 7, kind: output, shape index: {1}]   ;;  %s2132_s8 = inlined_call_operand.vmem [shape: bf16[2,128,32], index: 8, kind: output, shape index: {2}]  }
   0x1   :  { %s1534_s29 = smov 0  }
   0x2 LB: > { %s31_s30 = sadd.s32 1, %s1478_s28  ;;  %p1324_p0 = scmp.ge.s32.totalorder %s1482_s29, 1  ;;  %s1482_s29 = sphi %s1534_s29, %s19_s29   ;;  %s1478_s28 = sphi %s1532_s28, %s2146_s28   ;;  %s1474_s27 = sphi %s1530_s27, %s2145_s27  }
   0x3   : > { %p33_p1 = scmp.ge.s32.totalorder %s31_s30, 2  ;;  %p292_p2 = scmp.lt.s32.totalorder %s1482_s29, 3 }
   0x5   : > { %s2148_s30 = smov (%p33_p1, %s31_s30), 0  ;;  %p293_p3 = pnand %p1324_p0, %p292_p2 }
   0x6   : > { %p353_p4 = scmp.lt.s32.totalorder (!%p293_p3), %s1474_s27, 1 }
   0x7   : > { %296 = sbr.rel (%p293_p3) target bundleno = 604 (0x25c), region = 44 }
   0xc   : > { %s2150_s27 = smov (!%p353_p4, %s1474_s27), 1  ;;  %vm411_vm0 = vcmask 261120   ;;  %v1484_v20 = vmov 32.0  }
   0xd   : > { %s1383_s9 = sshll.u32 %s2150_s27, 7  ;;  %1426 = vrcp.f32 %v1484_v20  ;;  %s1936_s11 = sshll.u32 %s2150_s27, 6 }
   0xe   : > { %s1554_s12 = scalar_lea.vmem %s2124_s0, %s1383_s9  ;;  %s1947_s27 = scalar_lea.vmem %s2130_s6, %s1936_s11 }
   0xf   : > { %v405_v0 = vld [vmem:[%s1554_s12 + $0x60] sm:$0xff]  ;;  %v395_v4 = vld [vmem:[%s1554_s12 + $0x10] sm:$0xff]  ;;  %v406_v6 = vld [vmem:[%s1554_s12 + $0x68] sm:$0xff]  ;;  %s1954_s16 = scalar_lea.vmem %s2131_s7, %s1936_s11  ;;  %s1986_s19 = scalar_lea.vmem %s2132_s8, %s1936_s11 }
  0x10   : > { %v393_v1 = vld [vmem:[%s1554_s12] sm:$0xff]  ;;  %v448_v2 = vsel %vm411_vm0, %v405_v0, 0.0  ;;  %v418_v5 = vsel %vm411_vm0, %v395_v4, 0.0  ;;  %v394_v7 = vld [vmem:[%s1554_s12 + $0x8] sm:$0xff]  ;;  %v1565_v8 = vld [vmem:[%s1554_s12 + $0x18] sm:$0xff]  ;;  %v451_v9 = vsel %vm411_vm0, %v406_v6, 0.0 }
  0x11   : > { %v412_v3 = vsel %vm411_vm0, %v393_v1, 0.0  ;;  %449 = vadd.xlane.f32.xlu1 %v448_v2  ;;  %419 = vadd.xlane.f32.xlu2 %v418_v5  ;;  %v415_v10 = vsel %vm411_vm0, %v394_v7, 0.0  ;;  %v421_v11 = vsel %vm411_vm0, %v1565_v8, 0.0  ;;  %v407_v12 = vld [vmem:[%s1554_s12 + $0x70] sm:$0xff]  ;;  %v408_v13 = vld [vmem:[%s1554_s12 + $0x78] sm:$0xff]  ;;  %v1574_v14 = vld [vmem:[%s1554_s12 + $0x20] sm:$0xff] }
  0x12   : > { %413 = vadd.xlane.f32.xlu0 %v412_v3  ;;  %v454_v15 = vsel %vm411_vm0, %v407_v12, 0.0  ;;  %v457_v16 = vsel %vm411_vm0, %v408_v13, 0.0  ;;  %v424_v17 = vsel %vm411_vm0, %v1574_v14, 0.0  ;;  %v1581_v18 = vld [vmem:[%s1554_s12 + $0x28] sm:$0xff]  ;;  %v1603_v43 = vld [vmem:[%s1554_s12 + $0x38] sm:$0xff]  ;;  %v1627_v60 = vld [vmem:[%s1554_s12 + $0x30] sm:$0xff] }
  0x13   : > { %v427_v19 = vsel %vm411_vm0, %v1581_v18, 0.0  ;;  %v1427_v21 = vpop.eup %1426  ;;  %v433_v48 = vsel %vm411_vm0, %v1603_v43, 0.0 }
  0x14   : > { %v461_v22 = vmul.f32 32.0, %v1427_v21  ;;  %vm465_vm1 = vweird.f32 %v1427_v21 }
  0x16   : > { %v462_v23 = vsub.f32 1.0, %v461_v22  ;;  %v1673_v22 = vld [vmem:[%s1554_s12 + $0x58] sm:$0xff] }
  0x18   : > { %v463_v24 = vmul.f32 %v1427_v21, %v462_v23 }
  0x19   : > { %452 = vadd.xlane.f32.xlu1 %v451_v9  ;;  %422 = vadd.xlane.f32.xlu2 %v421_v11 }
  0x1a   : > { %416 = vadd.xlane.f32.xlu0 %v415_v10  ;;  %v464_v25 = vadd.f32 %v1427_v21, %v463_v24  ;;  %v445_v24 = vsel %vm411_vm0, %v1673_v22, 0.0 }
  0x1c   : > { %v1585_v26 = vsel %vm465_vm1, %v1427_v21, %v464_v25 }
  0x21   : > { %458 = vadd.xlane.f32.xlu1 %v457_v16  ;;  %425 = vadd.xlane.f32.xlu2 %v424_v17  ;;  %v1662_v16 = vld [vmem:[%s1554_s12 + $0x40] sm:$0xff] }
  0x22   : > { %455 = vadd.xlane.f32.xlu0 %v454_v15  ;;  %v1658_v15 = vld [vmem:[%s1554_s12 + $0x50] sm:$0xff]  ;;  %v436_v20 = vsel %vm411_vm0, %v1662_v16, 0.0 }
  0x2a   : > { %428 = vadd.xlane.f32.xlu0 %v427_v19  ;;  %v442_v19 = vsel %vm411_vm0, %v1658_v15, 0.0 }
  0x84   : > { %v450_v27 = vpop.xlane.xlu1 %449  ;;  %v420_v31 = vpop.xlane.xlu2 %419 }
  0x85   : > { %v414_v28 = vpop.xlane.xlu0 %413  ;;  %v479_v29 = vmul.f32 %v1585_v26, %v450_v27  ;;  %v469_v42 = vmul.f32 %v1585_v26, %v420_v31  ;;  %v1390_v31 = vld [vmem:[%s2128_s4 + $0x8] sm:$0xff] }
  0x86   : > { %v467_v30 = vmul.f32 %v1585_v26, %v414_v28  ;;  %961 = vmatpush.bf16.msra.mxu1 %v1390_v31 }
  0x87   : > { %v1589_v32 = vsub.f32 %v405_v0, %v479_v29  ;;  %v1609_v47 = vsub.f32 %v395_v4, %v469_v42 }
  0x88   : > { %v1591_v33 = vsub.f32 %v393_v1, %v467_v30  ;;  %v430_v1 = vsel %vm411_vm0, %v1627_v60, 0.0  ;;  %v1388_v30 = vld [vmem:[%s2127_s3 + $0x8] sm:$0xff] }
  0x89   : > { %v511_v34 = vmul.f32 %v1589_v32, %v1589_v32  ;;  %v501_v57 = vmul.f32 %v1609_v47, %v1609_v47  ;;  %863 = vmatpush.bf16.msra.mxu0 %v1388_v30  ;;  %1393 = vmatpush.bf16.msra.mxu3 %v1388_v30 }
  0x8a   : > { %v499_v35 = vmul.f32 %v1591_v33, %v1591_v33 }
  0x8b   : > { %v551_v36 = vsel %vm411_vm0, %v511_v34, 0.0  ;;  %v521_v62 = vsel %vm411_vm0, %v501_v57, 0.0  ;;  %v1691_v34 = vld [vmem:[%s2129_s5 + $0x8] sm:$0xff] }
  0x8c   : > { %v515_v37 = vsel %vm411_vm0, %v499_v35, 0.0  ;;  %v453_v38 = vpop.xlane.xlu1 %452  ;;  %552 = vadd.xlane.f32.xlu0 %v551_v36  ;;  %v423_v46 = vpop.xlane.xlu2 %422  ;;  %1058 = vmatpush.bf16.msra.mxu2 %v1691_v34 }
  0x8d   : > { %516 = vadd.xlane.f32.xlu1 %v515_v37  ;;  %v417_v39 = vpop.xlane.xlu0 %416  ;;  %v480_v40 = vmul.f32 %v1585_v26, %v453_v38  ;;  %v470_v58 = vmul.f32 %v1585_v26, %v423_v46  ;;  %v1387_v37 = vld [vmem:[%s2127_s3] sm:$0xff] }
  0x8e   : > { %v468_v41 = vmul.f32 %v1585_v26, %v417_v39  ;;  %v1389_v38 = vld [vmem:[%s2128_s4] sm:$0xff]  ;;  %864 = vmatpush.bf16.msra.mxu0 %v1387_v37  ;;  %1394 = vmatpush.bf16.msra.mxu3 %v1387_v37 }
  0x8f   : > { %v1605_v44 = vsub.f32 %v406_v6, %v480_v40  ;;  %v1635_v0 = vsub.f32 %v1565_v8, %v470_v58  ;;  %v1705_v39 = vld [vmem:[%s2129_s5] sm:$0xff]  ;;  %962 = vmatpush.bf16.msra.mxu1 %v1389_v38 }
  0x90   : > { %v1607_v45 = vsub.f32 %v394_v7, %v468_v41  ;;  %v1646_v7 = vld [vmem:[%s1554_s12 + $0x48] sm:$0xff]  ;;  %1059 = vmatpush.bf16.msra.mxu2 %v1705_v39 }
  0x91   : > { %v512_v49 = vmul.f32 %v1605_v44, %v1605_v44  ;;  %v502_v6 = vmul.f32 %v1635_v0, %v1635_v0  ;;  %v439_v10 = vsel %vm411_vm0, %v1646_v7, 0.0 }
  0x92   : > { %v500_v50 = vmul.f32 %v1607_v45, %v1607_v45  ;;  %1395 = vmatpush.bf16.msrb.mxu3 %v1390_v31 }
  0x93   : > { %v554_v51 = vsel %vm411_vm0, %v512_v49, 0.0  ;;  %v524_v11 = vsel %vm411_vm0, %v502_v6, 0.0 }
  0x94   : > { %v518_v52 = vsel %vm411_vm0, %v500_v50, 0.0  ;;  %434 = vadd.xlane.f32.xlu0 %v433_v48  ;;  %v459_v54 = vpop.xlane.xlu1 %458  ;;  %v426_v2 = vpop.xlane.xlu2 %425 }
  0x95   : > { %555 = vadd.xlane.f32.xlu1 %v554_v51  ;;  %v456_v53 = vpop.xlane.xlu0 %455  ;;  %519 = vadd.xlane.f32.xlu2 %v518_v52  ;;  %v482_v56 = vmul.f32 %v1585_v26, %v459_v54  ;;  %v471_v4 = vmul.f32 %v1585_v26, %v426_v2 }
  0x96   : > { %v481_v55 = vmul.f32 %v1585_v26, %v456_v53  ;;  %1396 = vmatpush.bf16.msrb.mxu3 %v1389_v38 }
  0x97   : > { %v1629_v61 = vsub.f32 %v408_v13, %v482_v56  ;;  %v1649_v8 = vsub.f32 %v1574_v14, %v471_v4 }
  0x98   : > { %v1624_v59 = vsub.f32 %v407_v12, %v481_v55 }
  0x99   : > { %v514_v5 = vmul.f32 %v1629_v61, %v1629_v61  ;;  %v503_v13 = vmul.f32 %v1649_v8, %v1649_v8 }
  0x9a   : > { %v513_v63 = vmul.f32 %v1624_v59, %v1624_v59 }
  0x9b   : > { %v560_v9 = vsel %vm411_vm0, %v514_v5, 0.0  ;;  %v527_v17 = vsel %vm411_vm0, %v503_v13, 0.0 }
  0x9c   : > { %v557_v3 = vsel %vm411_vm0, %v513_v63, 0.0 }
  0x9d   : > { %522 = vadd.xlane.f32.xlu1 %v521_v62  ;;  %558 = vadd.xlane.f32.xlu0 %v557_v3  ;;  %v429_v12 = vpop.xlane.xlu0 %428 }
  0x9e   : > { %431 = vadd.xlane.f32.xlu2 %v430_v1  ;;  %v472_v14 = vmul.f32 %v1585_v26, %v429_v12 }
  0xa0   : > { %v1670_v21 = vsub.f32 %v1581_v18, %v472_v14 }
  0xa2   : > { %v504_v23 = vmul.f32 %v1670_v21, %v1670_v21 }
  0xa4   : > { %v530_v25 = vsel %vm411_vm0, %v504_v23, 0.0 }
  0xa5   : > { %561 = vadd.xlane.f32.xlu1 %v560_v9  ;;  %440 = vadd.xlane.f32.xlu0 %v439_v10 }
  0xa6   : > { %525 = vadd.xlane.f32.xlu2 %v524_v11 }
  0xad   : > { %528 = vadd.xlane.f32.xlu1 %v527_v17  ;;  %443 = vadd.xlane.f32.xlu0 %v442_v19 }
  0xae   : > { %437 = vadd.xlane.f32.xlu2 %v436_v20 }
  0xb5   : > { %446 = vadd.xlane.f32.xlu1 %v445_v24 }
  0xb6   : > { %531 = vadd.xlane.f32.xlu2 %v530_v25 }
  0xff   : > { %v553_v28 = vpop.xlane.xlu0 %552 }
 0x100   : > { %v517_v27 = vpop.xlane.xlu1 %516  ;;  %v575_v29 = vmul.f32 %v553_v28, %v1585_v26 }
 0x101   : > { %v563_v18 = vmul.f32 %v517_v27, %v1585_v26 }
 0x102   : > { %v1693_v36 = vadd.f32 1e-05, %v575_v29 }
 0x103   : > { %v579_v35 = vadd.f32 1e-05, %v563_v18 }
 0x104   : > { %vm721_vm2 = vweird.f32 %v1693_v36 }
 0x105   : > { %1428 = vrsqrt.f32 %v579_v35  ;;  %vm601_vm5 = vweird.f32 %v579_v35 }
 0x106   : > { %1430 = vrsqrt.f32 %v1693_v36 }
 0x107   : > { %v435_v41 = vpop.xlane.xlu0 %434 }
 0x108   : > { %v556_v40 = vpop.xlane.xlu1 %555  ;;  %v520_v46 = vpop.xlane.xlu2 %519  ;;  %v474_v48 = vmul.f32 %v1585_v26, %v435_v41 }
 0x109   : > { %v576_v42 = vmul.f32 %v556_v40, %v1585_v26  ;;  %v564_v49 = vmul.f32 %v520_v46, %v1585_v26 }
 0x10a   : > { %v1715_v52 = vsub.f32 %v1603_v43, %v474_v48 }
 0x10b   : > { %v1429_v50 = vpop.eup %1428  ;;  %v1712_v51 = vadd.f32 1e-05, %v576_v42  ;;  %v1717_v55 = vadd.f32 1e-05, %v564_v49 }
 0x10c   : > { %v1431_v53 = vpop.eup %1430  ;;  %v596_v54 = vmul.f32 %v1429_v50, %v579_v35  ;;  %v506_v58 = vmul.f32 %v1715_v52, %v1715_v52  ;;  %vm602_vm3 = vweird.f32 %v1429_v50 }
 0x10d   : > { %v716_v56 = vmul.f32 %v1431_v53, %v1693_v36  ;;  %1432 = vrsqrt.f32 %v1712_v51  ;;  %vm722_vm4 = vweird.f32 %v1431_v53  ;;  %vm1739_vm6 = vmor %vm601_vm5, %vm602_vm3  ;;  %vm731_vm8 = vweird.f32 %v1712_v51 }
 0x10e   : > { %v597_v57 = vmul.f32 %v1429_v50, %v596_v54  ;;  %1434 = vrsqrt.f32 %v1717_v55  ;;  %v536_v43 = vsel %vm411_vm0, %v506_v58, 0.0  ;;  %vm1748_vm7 = vmor %vm721_vm2, %vm722_vm4  ;;  %vm611_vm9 = vweird.f32 %v1717_v55 }
 0x10f   : > { %v717_v62 = vmul.f32 %v1431_v53, %v716_v56  ;;  %537 = vadd.xlane.f32.xlu0 %v536_v43 }
 0x110   : > { %v598_v63 = vmul.f32 0.5, %v597_v57  ;;  %v523_v1 = vpop.xlane.xlu1 %522  ;;  %v559_v2 = vpop.xlane.xlu0 %558 }
 0x111   : > { %v718_v3 = vmul.f32 0.5, %v717_v62  ;;  %v565_v4 = vmul.f32 %v523_v1, %v1585_v26  ;;  %v432_v5 = vpop.xlane.xlu2 %431  ;;  %v577_v6 = vmul.f32 %v559_v2, %v1585_v26 }
 0x112   : > { %v599_v9 = vsub.f32 1.5, %v598_v63  ;;  %v473_v10 = vmul.f32 %v1585_v26, %v432_v5 }
 0x113   : > { %v1433_v11 = vpop.eup %1432  ;;  %v719_v12 = vsub.f32 1.5, %v718_v3  ;;  %v1729_v13 = vadd.f32 1e-05, %v565_v4  ;;  %v1731_v14 = vadd.f32 1e-05, %v577_v6 }
 0x114   : > { %v1435_v17 = vpop.eup %1434  ;;  %v600_v19 = vmul.f32 %v1429_v50, %v599_v9  ;;  %v726_v20 = vmul.f32 %v1433_v11, %v1712_v51  ;;  %v1735_v23 = vsub.f32 %v1627_v60, %v473_v10  ;;  %vm732_vm10 = vweird.f32 %v1433_v11 }
 0x115   : > { %v720_v24 = vmul.f32 %v1431_v53, %v719_v12  ;;  %v606_v25 = vmul.f32 %v1435_v17, %v1717_v55  ;;  %1436 = vrsqrt.f32 %v1729_v13  ;;  %vm612_vm11 = vweird.f32 %v1435_v17  ;;  %vm733_vm12 = vmor %vm731_vm8, %vm732_vm10 }
 0x116   : > { %v727_v28 = vmul.f32 %v1433_v11, %v726_v20  ;;  %1438 = vrsqrt.f32 %v1731_v14  ;;  %v604_v18 = vsel %vm1739_vm6, %v1429_v50, %v600_v19  ;;  %v505_v37 = vmul.f32 %v1735_v23, %v1735_v23  ;;  %vm613_vm14 = vmor %vm611_vm9, %vm612_vm11  ;;  %v1804_v20 = vld [vmem:[%s2126_s2] ss:$0 sm:$0xff] }
 0x117   : > { %v607_v29 = vmul.f32 %v1435_v17, %v606_v25  ;;  %v724_v30 = vsel %vm1748_vm7, %v1431_v53, %v720_v24  ;;  %v755_v46 = vmul.f32 %v604_v18, %v1591_v33  ;;  %v1766_v53 = vld [vmem:[%s2125_s1] ss:$0 sm:$0xff]  ;;  %vm741_vm13 = vweird.f32 %v1731_v14 }
 0x118   : > { %v728_v31 = vmul.f32 0.5, %v727_v28  ;;  %v562_v35 = vpop.xlane.xlu1 %561  ;;  %v441_v38 = vpop.xlane.xlu0 %440  ;;  %v533_v50 = vsel %vm411_vm0, %v505_v37, 0.0  ;;  %v767_v56 = vmul.f32 %v724_v30, %v1589_v32  ;;  %vm621_vm2 = vweird.f32 %v1729_v13 }
 0x119   : > { %v608_v36 = vmul.f32 0.5, %v607_v29  ;;  %v578_v40 = vmul.f32 %v562_v35, %v1585_v26  ;;  %v526_v41 = vpop.xlane.xlu2 %525  ;;  %v476_v42 = vmul.f32 %v1585_v26, %v441_v38  ;;  %534 = vadd.xlane.f32.xlu2 %v533_v50 }
 0x11a   : > { %v729_v48 = vsub.f32 1.5, %v728_v31  ;;  %v566_v49 = vmul.f32 %v526_v41, %v1585_v26  ;;  %v786_v9 = vmul.f32 %v1766_v53, %v767_v56 }
 0x11b   : > { %v1768_v54 = vpop.eup %1436  ;;  %v609_v57 = vsub.f32 1.5, %v608_v36  ;;  %v1771_v58 = vadd.f32 1e-05, %v578_v40  ;;  %v1780_v43 = vsub.f32 %v1646_v7, %v476_v42  ;;  %v774_v7 = vmul.f32 %v1766_v53, %v755_v46 }
 0x11c   : > { %v1773_v33 = vpop.eup %1438  ;;  %v730_v62 = vmul.f32 %v1433_v11, %v729_v48  ;;  %v616_v63 = vmul.f32 %v1768_v54, %v1729_v13  ;;  %v1777_v1 = vadd.f32 1e-05, %v566_v49  ;;  %vm622_vm15 = vweird.f32 %v1768_v54 }
 0x11d   : > { %v610_v32 = vmul.f32 %v1435_v17, %v609_v57  ;;  %v736_v2 = vmul.f32 %v1773_v33, %v1731_v14  ;;  %1440 = vrsqrt.f32 %v1771_v58  ;;  %vm742_vm1 = vweird.f32 %v1773_v33  ;;  %vm1849_vm6 = vmor %vm621_vm2, %vm622_vm15 }
 0x11e   : > { %v734_v3 = vsel %vm733_vm12, %v1433_v11, %v730_v62  ;;  %v617_v4 = vmul.f32 %v1768_v54, %v616_v63  ;;  %1442 = vrsqrt.f32 %v1777_v1  ;;  %v508_v11 = vmul.f32 %v1780_v43, %v1780_v43  ;;  %vm1839_vm3 = vmor %vm741_vm13, %vm742_vm1 }
 0x11f   : > { %v768_v51 = vmul.f32 %v734_v3, %v1605_v44  ;;  %v614_v5 = vsel %vm613_vm14, %v1435_v17, %v610_v32  ;;  %v737_v6 = vmul.f32 %v1773_v33, %v736_v2  ;;  %v805_v41 = vadd.f32 %v1804_v20, %v786_v9 }
 0x120   : > { %v756_v10 = vmul.f32 %v614_v5, %v1607_v45  ;;  %v618_v12 = vmul.f32 0.5, %v617_v4  ;;  %v529_v55 = vpop.xlane.xlu1 %528  ;;  %v444_v19 = vpop.xlane.xlu0 %443  ;;  %v542_v18 = vsel %vm411_vm0, %v508_v11, 0.0  ;;  %vm751_vm4 = vweird.f32 %v1771_v58 }
 0x121   : > { %v738_v44 = vmul.f32 0.5, %v737_v6  ;;  %v567_v17 = vmul.f32 %v529_v55, %v1585_v26  ;;  %v438_v24 = vpop.xlane.xlu2 %437  ;;  %v477_v25 = vmul.f32 %v1585_v26, %v444_v19  ;;  %v787_v45 = vmul.f32 %v1766_v53, %v768_v51  ;;  %543 = vadd.xlane.f32.xlu2 %v542_v18 }
 0x122   : > { %v619_v27 = vsub.f32 1.5, %v618_v12  ;;  %v475_v28 = vmul.f32 %v1585_v26, %v438_v24  ;;  %v775_v60 = vmul.f32 %v1766_v53, %v756_v10  ;;  %vm631_vm9 = vweird.f32 %v1777_v1 }
 0x123   : > { %v1812_v29 = vpop.eup %1440  ;;  %v739_v30 = vsub.f32 1.5, %v738_v44  ;;  %v1815_v31 = vadd.f32 1e-05, %v567_v17  ;;  %v806_v35 = vadd.f32 %v1804_v20, %v787_v45  ;;  %v1824_v40 = vsub.f32 %v1658_v15, %v477_v25 }
 0x124   : > { %v1443_v37 = vpop.eup %1442  ;;  %v746_v38 = vmul.f32 %v1812_v29, %v1771_v58  ;;  %v1821_v36 = vsub.f32 %v1662_v16, %v475_v28  ;;  %v620_v42 = vmul.f32 %v1768_v54, %v619_v27  ;;  %v793_v16 = vadd.f32 %v1804_v20, %v774_v7 }
 0x125   : > { %v740_v46 = vmul.f32 %v1773_v33, %v739_v30  ;;  %v626_v48 = vmul.f32 %v1443_v37, %v1777_v1  ;;  %1444 = vrsqrt.f32 %v1815_v31  ;;  %v794_v50 = vadd.f32 %v1804_v20, %v775_v60 }
 0x126   : > { %v747_v49 = vmul.f32 %v1812_v29, %v746_v38  ;;  %vm752_vm5 = vweird.f32 %v1812_v29  ;;  %v1845_v13 = vpack.c.bf16 %v806_v35, %v805_v41  ;;  %v507_v2 = vmul.f32 %v1821_v36, %v1821_v36 }
 0x127   : > { %v627_v56 = vmul.f32 %v1443_v37, %v626_v48  ;;  %v744_v14 = vsel %vm1839_vm3, %v1773_v33, %v740_v46  ;;  %v809_v63 = vpack.c.bf16 %v794_v50, %v793_v16  ;;  %v624_v3 = vsel %vm1849_vm6, %v1768_v54, %v620_v42  ;;  %vm753_vm8 = vmor %vm751_vm4, %vm752_vm5 }
 0x128   : > { %v748_v62 = vmul.f32 0.5, %v747_v49  ;;  %v447_v32 = vpop.xlane.xlu1 %446  ;;  %1347 = vmatmul.msk.bf16.vlgmr.msra.gmra.mxu3 %vm411_vm0, %v1845_v13  ;;  %v509_v33 = vmul.f32 %v1824_v40, %v1824_v40  ;;  %vm632_vm7 = vweird.f32 %v1443_v37  ;;  %v539_v6 = vsel %vm411_vm0, %v507_v2, 0.0 }
 0x129   : > { %v628_v4 = vmul.f32 0.5, %v627_v56  ;;  %v478_v7 = vmul.f32 %v1585_v26, %v447_v32  ;;  %v532_v51 = vpop.xlane.xlu2 %531  ;;  %1341 = vmatmul.msk.bf16.vlgmr.msra.gmra.mxu0 %vm411_vm0, %v809_v63  ;;  %1357 = vmatmul.msk.bf16.vlgmr.msra.gmra.mxu1 %vm411_vm0, %v809_v63  ;;  %v769_v10 = vmul.f32 %v744_v14, %v1624_v59  ;;  %v757_v19 = vmul.f32 %v624_v3, %v1609_v47  ;;  %vm633_vm10 = vmor %vm631_vm9, %vm632_vm7 }
 0x12a   : > { %v749_v5 = vsub.f32 1.5, %v748_v62  ;;  %v568_v54 = vmul.f32 %v532_v51, %v1585_v26  ;;  %1373 = vmatmul.msk.bf16.vlgmr.msra.gmra.mxu2 %vm411_vm0, %v809_v63  ;;  %540 = vadd.xlane.f32.xlu1 %v539_v6  ;;  %v545_v11 = vsel %vm411_vm0, %v509_v33, 0.0  ;;  %vm641_vm11 = vweird.f32 %v1815_v31 }
 0x12b   : > { %v1445_v9 = vpop.eup %1444  ;;  %v629_v12 = vsub.f32 1.5, %v628_v4  ;;  %v1873_v55 = vsub.f32 %v1673_v22, %v478_v7  ;;  %546 = vadd.xlane.f32.xlu0 %v545_v11  ;;  %1397 = vmatpush.bf16.msra.mxu3 %v1691_v34  ;;  %v788_v27 = vmul.f32 %v1766_v53, %v769_v10  ;;  %v776_v1 = vmul.f32 %v1766_v53, %v757_v19 }
 0x12c   : > { %v750_v44 = vmul.f32 %v1812_v29, %v749_v5  ;;  %v636_v17 = vmul.f32 %v1445_v9, %v1815_v31  ;;  %v584_v24 = vadd.f32 1e-05, %v568_v54  ;;  %vm642_vm12 = vweird.f32 %v1445_v9 }
 0x12d   : > { %v630_v59 = vmul.f32 %v1443_v37, %v629_v12  ;;  %v510_v22 = vmul.f32 %v1873_v55, %v1873_v55  ;;  %vm643_vm13 = vmor %vm641_vm11, %vm642_vm12 }
 0x12e   : > { %v754_v47 = vsel %vm753_vm8, %v1812_v29, %v750_v44  ;;  %v637_v25 = vmul.f32 %v1445_v9, %v636_v17  ;;  %1446 = vrsqrt.f32 %v584_v24  ;;  %vm651_vm14 = vweird.f32 %v584_v24 }
 0x12f   : > { %v770_v45 = vmul.f32 %v754_v47, %v1629_v61  ;;  %v634_v34 = vsel %vm633_vm10, %v1443_v37, %v630_v59  ;;  %v548_v18 = vsel %vm411_vm0, %v510_v22, 0.0  ;;  %1398 = vmatpush.bf16.msra.mxu3 %v1705_v39  ;;  %v807_v61 = vadd.f32 %v1804_v20, %v788_v27 }
 0x130   : > { %v758_v58 = vmul.f32 %v634_v34, %v1635_v0  ;;  %v638_v28 = vmul.f32 0.5, %v637_v25  ;;  %v795_v0 = vadd.f32 %v1804_v20, %v776_v1  ;;  %vm922_vm8 = vcmask 257024  }
 0x131   : > { %v789_v60 = vmul.f32 %v1766_v53, %v770_v45 }
 0x132   : > { %v639_v29 = vsub.f32 1.5, %v638_v28  ;;  %v777_v30 = vmul.f32 %v1766_v53, %v758_v58  ;;  %549 = vadd.xlane.f32.xlu1 %v548_v18 }
 0x133   : > { %v808_v35 = vadd.f32 %v1804_v20, %v789_v60 }
 0x134   : > { %v1447_v37 = vpop.eup %1446  ;;  %v796_v38 = vadd.f32 %v1804_v20, %v777_v30  ;;  %v640_v41 = vmul.f32 %v1445_v9, %v639_v29 }
 0x135   : > { %v646_v39 = vmul.f32 %v1447_v37, %v584_v24  ;;  %v816_v42 = vpack.c.bf16 %v808_v35, %v807_v61  ;;  %vm652_vm15 = vweird.f32 %v1447_v37 }
 0x136   : > { %v810_v46 = vpack.c.bf16 %v796_v38, %v795_v0  ;;  %v644_v49 = vsel %vm643_vm13, %v1445_v9, %v640_v41  ;;  %vm653_vm1 = vmor %vm651_vm14, %vm652_vm15 }
 0x137   : > { %v647_v48 = vmul.f32 %v1447_v37, %v646_v39  ;;  %v759_v50 = vmul.f32 %v644_v49, %v1649_v8 }
 0x138   : > { %1348 = vmatmul.msk.bf16.gmra.mxu3 %vm411_vm0, %v816_v42 }
 0x139   : > { %v648_v16 = vmul.f32 0.5, %v647_v48  ;;  %1342 = vmatmul.msk.bf16.gmra.mxu0 %vm411_vm0, %v810_v46  ;;  %1358 = vmatmul.msk.bf16.gmra.mxu1 %vm411_vm0, %v810_v46  ;;  %v778_v14 = vmul.f32 %v1766_v53, %v759_v50 }
 0x13a   : > { %1374 = vmatmul.msk.bf16.gmra.mxu2 %vm411_vm0, %v810_v46 }
 0x13b   : > { %v649_v31 = vsub.f32 1.5, %v648_v16  ;;  %v797_v63 = vadd.f32 %v1804_v20, %v778_v14 }
 0x13d   : > { %v650_v15 = vmul.f32 %v1447_v37, %v649_v31 }
 0x13f   : > { %v654_v56 = vsel %vm653_vm1, %v1447_v37, %v650_v15 }
 0x140   : > { %v760_v57 = vmul.f32 %v654_v56, %v1670_v21 }
 0x142   : > { %v779_v62 = vmul.f32 %v1766_v53, %v760_v57 }
 0x144   : > { %v798_v32 = vadd.f32 %v1804_v20, %v779_v62 }
 0x146   : > { %v811_v2 = vpack.c.bf16 %v798_v32, %v797_v63 }
 0x148   : > { %1363 = vmatmul.msk.bf16.vlgmr.msrb.gmra.mxu3 %vm411_vm0, %v1845_v13 }
 0x149   : > { %1343 = vmatmul.msk.bf16.gmra.mxu0 %vm411_vm0, %v811_v2  ;;  %1359 = vmatmul.msk.bf16.gmra.mxu1 %vm411_vm0, %v811_v2 }
 0x14a   : > { %1375 = vmatmul.msk.bf16.gmra.mxu2 %vm411_vm0, %v811_v2 }
 0x158   : > { %1364 = vmatmul.msk.bf16.gmra.mxu3 %vm411_vm0, %v816_v42 }
 0x168   : > { %1379 = vmatmul.msk.bf16.vlgmr.msra.gmra.mxu3 %vm411_vm0, %v1845_v13 }
 0x178   : > { %1380 = vmatmul.msk.bf16.gmra.mxu3 %vm411_vm0, %v816_v42 }
 0x182   : > { %v538_v8 = vpop.xlane.xlu0 %537 }
 0x183   : > { %v570_v21 = vmul.f32 %v538_v8, %v1585_v26 }
 0x185   : > { %v586_v3 = vadd.f32 1e-05, %v570_v21 }
 0x187   : > { %1448 = vrsqrt.f32 %v586_v3  ;;  %vm671_vm2 = vweird.f32 %v586_v3 }
 0x18c   : > { %v535_v4 = vpop.xlane.xlu2 %534 }
 0x18d   : > { %v1449_v7 = vpop.eup %1448  ;;  %v569_v51 = vmul.f32 %v535_v4, %v1585_v26 }
 0x18e   : > { %v666_v33 = vmul.f32 %v1449_v7, %v586_v3  ;;  %vm672_vm3 = vweird.f32 %v1449_v7 }
 0x18f   : > { %v585_v5 = vadd.f32 1e-05, %v569_v51  ;;  %vm673_vm4 = vmor %vm671_vm2, %vm672_vm3 }
 0x190   : > { %v667_v6 = vmul.f32 %v1449_v7, %v666_v33 }
 0x191   : > { %1450 = vrsqrt.f32 %v585_v5  ;;  %vm661_vm6 = vweird.f32 %v585_v5 }
 0x192   : > { %v668_v54 = vmul.f32 0.5, %v667_v6 }
 0x194   : > { %v544_v9 = vpop.xlane.xlu2 %543  ;;  %v669_v10 = vsub.f32 1.5, %v668_v54 }
 0x195   : > { %v572_v13 = vmul.f32 %v544_v9, %v1585_v26 }
 0x196   : > { %v670_v44 = vmul.f32 %v1449_v7, %v669_v10 }
 0x197   : > { %v1451_v12 = vpop.eup %1450  ;;  %v588_v11 = vadd.f32 1e-05, %v572_v13 }
 0x198   : > { %v656_v19 = vmul.f32 %v1451_v12, %v585_v5  ;;  %v674_v22 = vsel %vm673_vm4, %v1449_v7, %v670_v44  ;;  %vm662_vm5 = vweird.f32 %v1451_v12 }
 0x199   : > { %1452 = vrsqrt.f32 %v588_v11  ;;  %v762_v28 = vmul.f32 %v674_v22, %v1715_v52  ;;  %vm663_vm7 = vmor %vm661_vm6, %vm662_vm5  ;;  %vm691_vm9 = vweird.f32 %v588_v11 }
 0x19a   : > { %v657_v17 = vmul.f32 %v1451_v12, %v656_v19 }
 0x19b   : > { %v781_v37 = vmul.f32 %v1766_v53, %v762_v28 }
 0x19c   : > { %v658_v24 = vmul.f32 0.5, %v657_v17 }
 0x19d   : > { %v541_v59 = vpop.xlane.xlu1 %540  ;;  %v800_v15 = vadd.f32 %v1804_v20, %v781_v37 }
 0x19e   : > { %v571_v47 = vmul.f32 %v541_v59, %v1585_v26  ;;  %v547_v25 = vpop.xlane.xlu0 %546  ;;  %v659_v45 = vsub.f32 1.5, %v658_v24 }
 0x19f   : > { %v573_v34 = vmul.f32 %v547_v25, %v1585_v26  ;;  %v1926_v27 = vpop.eup %1452 }
 0x1a0   : > { %v1928_v58 = vadd.f32 1e-05, %v571_v47  ;;  %v660_v18 = vmul.f32 %v1451_v12, %v659_v45  ;;  %v686_v1 = vmul.f32 %v1926_v27, %v588_v11  ;;  %vm692_vm10 = vweird.f32 %v1926_v27 }
 0x1a1   : > { %v1932_v60 = vadd.f32 1e-05, %v573_v34  ;;  %vm1973_vm11 = vmor %vm691_vm9, %vm692_vm10 }
 0x1a2   : > { %1454 = vrsqrt.f32 %v1928_v58  ;;  %v664_v29 = vsel %vm663_vm7, %v1451_v12, %v660_v18  ;;  %v687_v30 = vmul.f32 %v1926_v27, %v686_v1  ;;  %vm681_vm13 = vweird.f32 %v1928_v58 }
 0x1a3   : > { %1456 = vrsqrt.f32 %v1932_v60  ;;  %v761_v61 = vmul.f32 %v664_v29, %v1735_v23  ;;  %vm701_vm15 = vweird.f32 %v1932_v60 }
 0x1a4   : > { %v688_v52 = vmul.f32 0.5, %v687_v30 }
 0x1a5   : > { %v550_v35 = vpop.xlane.xlu1 %549  ;;  %v780_v39 = vmul.f32 %v1766_v53, %v761_v61 }
 0x1a6   : > { %v574_v0 = vmul.f32 %v550_v35, %v1585_v26  ;;  %v866_v38 = vpop.f32.mrf.mxu0  ;;  %v964_v41 = vpop.f32.mrf.mxu1  ;;  %v689_v42 = vsub.f32 1.5, %v688_v52 }
 0x1a7   : > { %v906_v46 = vpack.c.bf16 %v866_v38, %v866_v38  ;;  %v1004_v26 = vpack.c.bf16 %v964_v41, %v964_v41  ;;  %v799_v49 = vadd.f32 %v1804_v20, %v780_v39 }
 0x1a8   : > { %v1455_v23 = vpop.eup %1454  ;;  %v1956_v48 = vadd.f32 1e-05, %v574_v0  ;;  %v690_v31 = vmul.f32 %v1926_v27, %v689_v42 }
 0x1a9   : > { %v1959_v16 = vpop.eup %1456  ;;  %v676_v50 = vmul.f32 %v1455_v23, %v1928_v58  ;;  %923 = vst.msk [vmem:[%s1947_s27] sm:$0xf] %vm922_vm8, %v906_v46  ;;  %v812_v14 = vpack.c.bf16 %v800_v15, %v799_v49  ;;  %vm682_vm12 = vweird.f32 %v1455_v23 }
 0x1aa   : > { %v696_v56 = vmul.f32 %v1959_v16, %v1932_v60  ;;  %1458 = vrsqrt.f32 %v1956_v48  ;;  %1020 = vst.msk [vmem:[%s1954_s16] sm:$0xf] %vm922_vm8, %v1004_v26  ;;  %v694_v2 = vsel %vm1973_vm11, %v1926_v27, %v690_v31  ;;  %vm683_vm14 = vmor %vm681_vm13, %vm682_vm12  ;;  %vm702_vm1 = vweird.f32 %v1959_v16 }
 0x1ab   : > { %v677_v57 = vmul.f32 %v1455_v23, %v676_v50  ;;  %v896_v62 = vpop.f32.mrf.mxu3  ;;  %1344 = vmatmul.msk.bf16.gmra.mxu0 %vm411_vm0, %v812_v14  ;;  %1360 = vmatmul.msk.bf16.gmra.mxu1 %vm411_vm0, %v812_v14  ;;  %v764_v9 = vmul.f32 %v694_v2, %v1780_v43  ;;  %vm711_vm2 = vweird.f32 %v1956_v48  ;;  %vm2018_vm4 = vmor %vm701_vm15, %vm702_vm1 }
 0x1ac   : > { %v918_v32 = vpack.c.bf16 %v896_v62, %v896_v62  ;;  %v697_v3 = vmul.f32 %v1959_v16, %v696_v56  ;;  %1376 = vmatmul.msk.bf16.gmra.mxu2 %vm411_vm0, %v812_v14 }
 0x1ad   : > { %v678_v8 = vmul.f32 0.5, %v677_v57  ;;  %v1061_v21 = vpop.f32.mrf.mxu2  ;;  %v783_v24 = vmul.f32 %v1766_v53, %v764_v9 }
 0x1ae   : > { %935 = vst.msk [vmem:[%s1947_s27 + $0x30] sm:$0xf] %vm922_vm8, %v918_v32  ;;  %v1101_v4 = vpack.c.bf16 %v1061_v21, %v1061_v21  ;;  %v868_v7 = vpop.f32.mrf.mxu0  ;;  %v966_v51 = vpop.f32.mrf.mxu1  ;;  %v698_v12 = vmul.f32 0.5, %v697_v3 }
 0x1af   : > { %v679_v33 = vsub.f32 1.5, %v678_v8  ;;  %v907_v5 = vpack.c.bf16 %v868_v7, %v868_v7  ;;  %v1005_v6 = vpack.c.bf16 %v966_v51, %v966_v51  ;;  %v802_v1 = vadd.f32 %v1804_v20, %v783_v24 }
 0x1b0   : > { %v1459_v54 = vpop.eup %1458  ;;  %1117 = vst.msk [vmem:[%s1986_s19] sm:$0xf] %vm922_vm8, %v1101_v4  ;;  %v699_v47 = vsub.f32 1.5, %v698_v12 }
 0x1b1   : > { %v680_v10 = vmul.f32 %v1455_v23, %v679_v33  ;;  %v706_v13 = vmul.f32 %v1459_v54, %v1956_v48  ;;  %924 = vst.msk [vmem:[%s1947_s27 + $0x4] sm:$0xf] %vm922_vm8, %v907_v5  ;;  %vm712_vm3 = vweird.f32 %v1459_v54 }
 0x1b2   : > { %1021 = vst.msk [vmem:[%s1954_s16 + $0x4] sm:$0xf] %vm922_vm8, %v1005_v6  ;;  %v700_v30 = vmul.f32 %v1959_v16, %v699_v47  ;;  %vm713_vm5 = vmor %vm711_vm2, %vm712_vm3 }
 0x1b3   : > { %v684_v11 = vsel %vm683_vm14, %v1455_v23, %v680_v10  ;;  %v707_v19 = vmul.f32 %v1459_v54, %v706_v13  ;;  %v898_v44 = vpop.f32.mrf.mxu3 }
 0x1b4   : > { %v763_v17 = vmul.f32 %v684_v11, %v1821_v36  ;;  %v919_v43 = vpack.c.bf16 %v898_v44, %v898_v44  ;;  %v704_v60 = vsel %vm2018_vm4, %v1959_v16, %v700_v30 }
 0x1b5   : > { %v708_v59 = vmul.f32 0.5, %v707_v19  ;;  %v1063_v22 = vpop.f32.mrf.mxu2  ;;  %v765_v48 = vmul.f32 %v704_v60, %v1824_v40 }
 0x1b6   : > { %936 = vst.msk [vmem:[%s1947_s27 + $0x34] sm:$0xf] %vm922_vm8, %v919_v43  ;;  %v1102_v25 = vpack.c.bf16 %v1063_v22, %v1063_v22  ;;  %v871_v45 = vpop.f32.mrf.mxu0  ;;  %v969_v34 = vpop.f32.mrf.mxu1  ;;  %v782_v27 = vmul.f32 %v1766_v53, %v763_v17 }
 0x1b7   : > { %v709_v36 = vsub.f32 1.5, %v708_v59  ;;  %v908_v58 = vpack.c.bf16 %v871_v45, %v871_v45  ;;  %v1006_v28 = vpack.c.bf16 %v969_v34, %v969_v34 }
 0x1b8   : > { %1118 = vst.msk [vmem:[%s1986_s19 + $0x4] sm:$0xf] %vm922_vm8, %v1102_v25  ;;  %v801_v18 = vadd.f32 %v1804_v20, %v782_v27 }
 0x1b9   : > { %v710_v29 = vmul.f32 %v1459_v54, %v709_v36  ;;  %925 = vst.msk [vmem:[%s1947_s27 + $0x8] sm:$0xf] %vm922_vm8, %v908_v58 }
 0x1ba   : > { %1022 = vst.msk [vmem:[%s1954_s16 + $0x8] sm:$0xf] %vm922_vm8, %v1006_v28  ;;  %v813_v52 = vpack.c.bf16 %v802_v1, %v801_v18 }
 0x1bb   : > { %v901_v35 = vpop.f32.mrf.mxu3  ;;  %v714_v37 = vsel %vm713_vm5, %v1459_v54, %v710_v29 }
 0x1bc   : > { %v920_v0 = vpack.c.bf16 %v901_v35, %v901_v35  ;;  %1345 = vmatmul.msk.bf16.gmra.mxu0 %vm411_vm0, %v813_v52  ;;  %1361 = vmatmul.msk.bf16.gmra.mxu1 %vm411_vm0, %v813_v52  ;;  %v766_v46 = vmul.f32 %v714_v37, %v1873_v55  ;;  %v784_v55 = vmul.f32 %v1766_v53, %v765_v48 }
 0x1bd   : > { %v1066_v38 = vpop.f32.mrf.mxu2  ;;  %1377 = vmatmul.msk.bf16.gmra.mxu2 %vm411_vm0, %v813_v52 }
 0x1be   : > { %937 = vst.msk [vmem:[%s1947_s27 + $0x38] sm:$0xf] %vm922_vm8, %v920_v0  ;;  %v1103_v41 = vpack.c.bf16 %v1066_v38, %v1066_v38  ;;  %v873_v39 = vpop.f32.mrf.mxu0  ;;  %v971_v42 = vpop.f32.mrf.mxu1  ;;  %v785_v16 = vmul.f32 %v1766_v53, %v766_v46  ;;  %v803_v63 = vadd.f32 %v1804_v20, %v784_v55 }
 0x1bf   : > { %v909_v26 = vpack.c.bf16 %v873_v39, %v873_v39  ;;  %v1007_v23 = vpack.c.bf16 %v971_v42, %v971_v42 }
 0x1c0   : > { %1119 = vst.msk [vmem:[%s1986_s19 + $0x8] sm:$0xf] %vm922_vm8, %v1103_v41  ;;  %v804_v62 = vadd.f32 %v1804_v20, %v785_v16 }
 0x1c1   : > { %926 = vst.msk [vmem:[%s1947_s27 + $0xc] sm:$0xf] %vm922_vm8, %v909_v26 }
 0x1c2   : > { %1023 = vst.msk [vmem:[%s1954_s16 + $0xc] sm:$0xf] %vm922_vm8, %v1007_v23  ;;  %v814_v53 = vpack.c.bf16 %v804_v62, %v803_v63 }
 0x1c3   : > { %v903_v49 = vpop.f32.mrf.mxu3 }
 0x1c4   : > { %v921_v31 = vpack.c.bf16 %v903_v49, %v903_v49 }
 0x1c5   : > { %v1068_v50 = vpop.f32.mrf.mxu2 }
 0x1c6   : > { %938 = vst.msk [vmem:[%s1947_s27 + $0x3c] sm:$0xf] %vm922_vm8, %v921_v31  ;;  %v1104_v15 = vpack.c.bf16 %v1068_v50, %v1068_v50  ;;  %v876_v56 = vpop.f32.mrf.mxu0  ;;  %v974_v57 = vpop.f32.mrf.mxu1 }
 0x1c7   : > { %v910_v40 = vpack.c.bf16 %v876_v56, %v876_v56  ;;  %v1008_v14 = vpack.c.bf16 %v974_v57, %v974_v57 }
 0x1c8   : > { %1120 = vst.msk [vmem:[%s1986_s19 + $0xc] sm:$0xf] %vm922_vm8, %v1104_v15 }
 0x1c9   : > { %927 = vst.msk [vmem:[%s1947_s27 + $0x10] sm:$0xf] %vm922_vm8, %v910_v40 }
 0x1ca   : > { %1024 = vst.msk [vmem:[%s1954_s16 + $0x10] sm:$0xf] %vm922_vm8, %v1008_v14 }
 0x1cb   : > { %v994_v32 = vpop.f32.mrf.mxu3 }
 0x1cc   : > { %v1016_v2 = vpack.c.bf16 %v994_v32, %v994_v32  ;;  %1346 = vmatmul.msk.bf16.gmra.mxu0 %vm411_vm0, %v814_v53  ;;  %1362 = vmatmul.msk.bf16.gmra.mxu1 %vm411_vm0, %v814_v53 }
 0x1cd   : > { %v1071_v8 = vpop.f32.mrf.mxu2  ;;  %1378 = vmatmul.msk.bf16.gmra.mxu2 %vm411_vm0, %v814_v53 }
 0x1ce   : > { %1032 = vst.msk [vmem:[%s1954_s16 + $0x30] sm:$0xf] %vm922_vm8, %v1016_v2  ;;  %v1105_v21 = vpack.c.bf16 %v1071_v8, %v1071_v8  ;;  %v878_v20 = vpop.f32.mrf.mxu0  ;;  %v976_v3 = vpop.f32.mrf.mxu1 }
 0x1cf   : > { %v911_v4 = vpack.c.bf16 %v878_v20, %v878_v20  ;;  %v1009_v7 = vpack.c.bf16 %v976_v3, %v976_v3 }
 0x1d0   : > { %1121 = vst.msk [vmem:[%s1986_s19 + $0x10] sm:$0xf] %vm922_vm8, %v1105_v21 }
 0x1d1   : > { %928 = vst.msk [vmem:[%s1947_s27 + $0x14] sm:$0xf] %vm922_vm8, %v911_v4 }
 0x1d2   : > { %1025 = vst.msk [vmem:[%s1954_s16 + $0x14] sm:$0xf] %vm922_vm8, %v1009_v7 }
 0x1d3   : > { %v996_v51 = vpop.f32.mrf.mxu3 }
 0x1d4   : > { %v1017_v33 = vpack.c.bf16 %v996_v51, %v996_v51 }
 0x1d5   : > { %v1073_v5 = vpop.f32.mrf.mxu2 }
 0x1d6   : > { %1033 = vst.msk [vmem:[%s1954_s16 + $0x34] sm:$0xf] %vm922_vm8, %v1017_v33  ;;  %v1106_v6 = vpack.c.bf16 %v1073_v5, %v1073_v5 }
 0x1d8   : > { %1122 = vst.msk [vmem:[%s1986_s19 + $0x14] sm:$0xf] %vm922_vm8, %v1106_v6 }
 0x1db   : > { %v999_v54 = vpop.f32.mrf.mxu3 }
 0x1dc   : > { %v1018_v9 = vpack.c.bf16 %v999_v54, %v999_v54 }
 0x1de   : > { %1034 = vst.msk [vmem:[%s1954_s16 + $0x38] sm:$0xf] %vm922_vm8, %v1018_v9 }
 0x1e3   : > { %v1001_v10 = vpop.f32.mrf.mxu3 }
 0x1e4   : > { %v1019_v13 = vpack.c.bf16 %v1001_v10, %v1001_v10 }
 0x1e6   : > { %1035 = vst.msk [vmem:[%s1954_s16 + $0x3c] sm:$0xf] %vm922_vm8, %v1019_v13 }
 0x1eb   : > { %v1091_v12 = vpop.f32.mrf.mxu3 }
 0x1ec   : > { %v1113_v11 = vpack.c.bf16 %v1091_v12, %v1091_v12 }
 0x1ee   : > { %1129 = vst.msk [vmem:[%s1986_s19 + $0x30] sm:$0xf] %vm922_vm8, %v1113_v11 }
 0x1f3   : > { %v1093_v19 = vpop.f32.mrf.mxu3 }
 0x1f4   : > { %v1114_v44 = vpack.c.bf16 %v1093_v19, %v1093_v19 }
 0x1f6   : > { %1130 = vst.msk [vmem:[%s1986_s19 + $0x34] sm:$0xf] %vm922_vm8, %v1114_v44 }
 0x1fb   : > { %v1096_v17 = vpop.f32.mrf.mxu3 }
 0x1fc   : > { %v1115_v43 = vpack.c.bf16 %v1096_v17, %v1096_v17 }
 0x1fe   : > { %1131 = vst.msk [vmem:[%s1986_s19 + $0x38] sm:$0xf] %vm922_vm8, %v1115_v43 }
 0x203   : > { %v1098_v24 = vpop.f32.mrf.mxu3 }
 0x204   : > { %v1116_v59 = vpack.c.bf16 %v1098_v24, %v1098_v24 }
 0x206   : > { %1132 = vst.msk [vmem:[%s1986_s19 + $0x3c] sm:$0xf] %vm922_vm8, %v1116_v59 }
 0x228   : > { %v881_v22 = vpop.f32.mrf.mxu0  ;;  %v979_v47 = vpop.f32.mrf.mxu1 }
 0x229   : > { %v912_v25 = vpack.c.bf16 %v881_v22, %v881_v22  ;;  %v1010_v45 = vpack.c.bf16 %v979_v47, %v979_v47 }
 0x22b   : > { %929 = vst.msk [vmem:[%s1947_s27 + $0x18] sm:$0xf] %vm922_vm8, %v912_v25 }
 0x22c   : > { %1026 = vst.msk [vmem:[%s1954_s16 + $0x18] sm:$0xf] %vm922_vm8, %v1010_v45 }
 0x22f   : > { %v1076_v34 = vpop.f32.mrf.mxu2 }
 0x230   : > { %v1107_v27 = vpack.c.bf16 %v1076_v34, %v1076_v34  ;;  %v883_v36 = vpop.f32.mrf.mxu0  ;;  %v981_v58 = vpop.f32.mrf.mxu1 }
 0x231   : > { %v913_v28 = vpack.c.bf16 %v883_v36, %v883_v36  ;;  %v1011_v18 = vpack.c.bf16 %v981_v58, %v981_v58 }
 0x232   : > { %1123 = vst.msk [vmem:[%s1986_s19 + $0x18] sm:$0xf] %vm922_vm8, %v1107_v27 }
 0x233   : > { %930 = vst.msk [vmem:[%s1947_s27 + $0x1c] sm:$0xf] %vm922_vm8, %v913_v28 }
 0x234   : > { %1027 = vst.msk [vmem:[%s1954_s16 + $0x1c] sm:$0xf] %vm922_vm8, %v1011_v18 }
 0x237   : > { %v1078_v1 = vpop.f32.mrf.mxu2 }
 0x238   : > { %v1108_v29 = vpack.c.bf16 %v1078_v1, %v1078_v1 }
 0x239   : > { %v886_v30 = vpop.f32.mrf.mxu0  ;;  %v984_v61 = vpop.f32.mrf.mxu1 }
 0x23a   : > { %v914_v52 = vpack.c.bf16 %v886_v30, %v886_v30  ;;  %v1012_v35 = vpack.c.bf16 %v984_v61, %v984_v61  ;;  %1124 = vst.msk [vmem:[%s1986_s19 + $0x1c] sm:$0xf] %vm922_vm8, %v1108_v29 }
 0x23c   : > { %931 = vst.msk [vmem:[%s1947_s27 + $0x20] sm:$0xf] %vm922_vm8, %v914_v52 }
 0x23d   : > { %1028 = vst.msk [vmem:[%s1954_s16 + $0x20] sm:$0xf] %vm922_vm8, %v1012_v35 }
 0x240   : > { %v1081_v37 = vpop.f32.mrf.mxu2 }
 0x241   : > { %v1109_v0 = vpack.c.bf16 %v1081_v37, %v1081_v37  ;;  %v888_v38 = vpop.f32.mrf.mxu0  ;;  %v986_v60 = vpop.f32.mrf.mxu1 }
 0x242   : > { %v915_v41 = vpack.c.bf16 %v888_v38, %v888_v38  ;;  %v1013_v39 = vpack.c.bf16 %v986_v60, %v986_v60 }
 0x243   : > { %1125 = vst.msk [vmem:[%s1986_s19 + $0x20] sm:$0xf] %vm922_vm8, %v1109_v0 }
 0x244   : > { %932 = vst.msk [vmem:[%s1947_s27 + $0x24] sm:$0xf] %vm922_vm8, %v915_v41 }
 0x245   : > { %1029 = vst.msk [vmem:[%s1954_s16 + $0x24] sm:$0xf] %vm922_vm8, %v1013_v39 }
 0x248   : > { %v1083_v42 = vpop.f32.mrf.mxu2 }
 0x249   : > { %v1110_v46 = vpack.c.bf16 %v1083_v42, %v1083_v42  ;;  %v891_v26 = vpop.f32.mrf.mxu0  ;;  %v989_v23 = vpop.f32.mrf.mxu1 }
 0x24a   : > { %v916_v48 = vpack.c.bf16 %v891_v26, %v891_v26  ;;  %v1014_v49 = vpack.c.bf16 %v989_v23, %v989_v23 }
 0x24b   : > { %1126 = vst.msk [vmem:[%s1986_s19 + $0x24] sm:$0xf] %vm922_vm8, %v1110_v46 }
 0x24c   : > { %933 = vst.msk [vmem:[%s1947_s27 + $0x28] sm:$0xf] %vm922_vm8, %v916_v48 }
 0x24d   : > { %1030 = vst.msk [vmem:[%s1954_s16 + $0x28] sm:$0xf] %vm922_vm8, %v1014_v49 }
 0x250   : > { %v1086_v16 = vpop.f32.mrf.mxu2 }
 0x251   : > { %v1111_v31 = vpack.c.bf16 %v1086_v16, %v1086_v16  ;;  %v893_v50 = vpop.f32.mrf.mxu0  ;;  %v991_v55 = vpop.f32.mrf.mxu1 }
 0x252   : > { %v917_v15 = vpack.c.bf16 %v893_v50, %v893_v50  ;;  %v1015_v56 = vpack.c.bf16 %v991_v55, %v991_v55 }
 0x253   : > { %1127 = vst.msk [vmem:[%s1986_s19 + $0x28] sm:$0xf] %vm922_vm8, %v1111_v31 }
 0x254   : > { %934 = vst.msk [vmem:[%s1947_s27 + $0x2c] sm:$0xf] %vm922_vm8, %v917_v15 }
 0x255   : > { %1031 = vst.msk [vmem:[%s1954_s16 + $0x2c] sm:$0xf] %vm922_vm8, %v1015_v56 }
 0x258   : > { %v1088_v57 = vpop.f32.mrf.mxu2 }
 0x259   : > { %v1112_v40 = vpack.c.bf16 %v1088_v57, %v1088_v57 }
 0x25b   : > { %1128 = vst.msk [vmem:[%s1986_s19 + $0x2c] sm:$0xf] %vm922_vm8, %v1112_v40 }
 0x25c PF: > { %s19_s29 = sadd.s32 1, %s1482_s29   ;;  %s2145_s27 = smov %s1478_s28 }
 0x25d   : > { %p16_p5 = scmp.ge.s32.totalorder %s19_s29, 4   ;;  %s2146_s28 = smov %s2148_s30 }
 0x25f   :  { %18 = sbr.rel (!%p16_p5) target bundleno = 2 (0x2), region = 98 }

</bundles_post_ra>
